<compile_context>
chip_gen: v5e
topology: v5e:2x2
jax: 0.10.0
libtpu: 0.0.40
codegen_flags: <defaults>
</compile_context>

<pallas_src>
import functools
import math

import jax
import jax.numpy as jnp
from jax.experimental import pallas as pl
from jax.experimental.pallas import tpu as pltpu


# 64 MiB scoped VMEM: above the 16 MiB (v5e) / 32 MiB (v6e, v7x) defaults, and not above
# v7x's 64 MiB physical VMEM.  Raise toward ~96 MiB on v5e/v6e for very large tiles.
_VMEM_LIMIT_BYTES = 64 * 1024 * 1024
# Default row-tile target.  Fine on v5e/v6e (128 MiB VMEM); use 128 on v7x at real shapes.
_DEFAULT_TILE = 256

_GELU_C = math.sqrt(2.0 / math.pi)


# ---------------------------------------------------------------------------
# In-kernel math helpers (always f32)
# ---------------------------------------------------------------------------

def _gelu(x):
    # tanh-approximate GELU (runs on the EUP) per perf review.
    # TODO(synk): switch to exact erf GELU (jax.lax.erf) if bit-exact HF parity is needed.
    return 0.5 * x * (1.0 + jnp.tanh(_GELU_C * (x + 0.044715 * (x * x * x))))


def _layernorm(x, g, b, eps):
    mean = jnp.mean(x, axis=-1, keepdims=True)
    xc = x - mean
    var = jnp.mean(xc * xc, axis=-1, keepdims=True)
    return xc * jax.lax.rsqrt(var + eps) * g + b


def _fit_tile(n, target):
    """Largest multiple of 8 <= target that divides n (n must be a multiple of 8)."""
    assert n % 8 == 0, f"dimension {n} must be a multiple of 8"
    t = min(target, n)
    while t > 8 and n % t != 0:
        t -= 8
    return t


def _round_up(n, m):
    return (n + m - 1) // m * m


def _cparams(*sem):
    return pltpu.CompilerParams(dimension_semantics=sem,
                                vmem_limit_bytes=_VMEM_LIMIT_BYTES)


# ---------------------------------------------------------------------------
# Pallas kernels
# ---------------------------------------------------------------------------

def _embed_ln_kernel(x_ref, g_ref, b_ref, o_ref, *, eps):
    x = x_ref[...].astype(jnp.float32)
    o_ref[...] = _layernorm(x, g_ref[...], b_ref[...], eps).astype(o_ref.dtype)


def _matmul_bias_kernel(x_ref, w_ref, b_ref, o_ref):
    acc = jnp.dot(x_ref[...], w_ref[...], preferred_element_type=jnp.float32)
    o_ref[...] = (acc + b_ref[...]).astype(o_ref.dtype)


def _mlm_transform_kernel(x_ref, w_ref, b_ref, g_ref, be_ref, o_ref, *, eps):
    # vocab_transform -> GELU -> vocab_layer_norm
    h = jnp.dot(x_ref[...], w_ref[...], preferred_element_type=jnp.float32)
    h = _gelu(h + b_ref[...])
    o_ref[...] = _layernorm(h, g_ref[...], be_ref[...], eps).astype(o_ref.dtype)


def _attn_ffn_kernel(x_ref, q_ref, k_ref, v_ref, kb_ref,
                     wo_ref, bo_ref, sa_g_ref, sa_b_ref,
                     w1_ref, b1_ref, w2_ref, b2_ref,
                     out_g_ref, out_b_ref, o_ref, ctx_ref, *, eps):
    """Attention (one batch, one q-tile, all heads) + out_lin + sa_LN + FFN + out_LN."""
    wdtype = wo_ref.dtype
    q = q_ref[...]                     # (nH, Tq, Dh) bf16, 1/sqrt(Dh) folded into q
    k = k_ref[...]                     # (nH, S,  Dh) bf16
    v = v_ref[...]                     # (nH, S,  Dh) bf16
    nH, _, Dh = q.shape

    # head-batched scores / context (back-to-back MXU dot_generals, no per-head loop)
    s = jnp.einsum('hqd,hkd->hqk', q, k,
                   preferred_element_type=jnp.float32)            # (nH, Tq, S)
    s = s + kb_ref[...]                                           # (1, 1, S) key mask
    m = jnp.max(s, axis=-1, keepdims=True)
    p = jnp.exp(s - m)
    p = p * pl.reciprocal(jnp.sum(p, axis=-1, keepdims=True), approx=True)
    ctx = jnp.einsum('hqk,hkd->hqd', p.astype(wdtype), v,
                     preferred_element_type=jnp.float32)          # (nH, Tq, Dh)

    # head merge: write each head's context into its natural column slice of a (Tq, H)
    # VMEM scratch, then ONE K=H out-projection matmul (no K=Dh per-head matmuls).
    for h in range(nH):
        ctx_ref[:, h * Dh:(h + 1) * Dh] = ctx[h].astype(wdtype)

    x_f32 = x_ref[...].astype(jnp.float32)
    sa = jnp.dot(ctx_ref[...], wo_ref[...],
                 preferred_element_type=jnp.float32) + bo_ref[...]
    x1 = _layernorm(sa + x_f32, sa_g_ref[...], sa_b_ref[...], eps)

    # FFN: lin1 -> GELU -> lin2, residual + LayerNorm
    h1 = jnp.dot(x1.astype(wdtype), w1_ref[...], preferred_element_type=jnp.float32)
    h1 = _gelu(h1 + b1_ref[...])
    h2 = jnp.dot(h1.astype(wdtype), w2_ref[...], preferred_element_type=jnp.float32)
    h2 = h2 + b2_ref[...]

    o_ref[...] = _layernorm(h2 + x1, out_g_ref[...], out_b_ref[...], eps).astype(o_ref.dtype)


# ---------------------------------------------------------------------------
# pallas_call wrappers
# ---------------------------------------------------------------------------

def embed_layernorm(x, g, b, *, tile_m, eps=1e-12):
    M, H = x.shape
    return pl.pallas_call(
        functools.partial(_embed_ln_kernel, eps=eps),
        out_shape=jax.ShapeDtypeStruct((M, H), x.dtype),
        grid=(M // tile_m,),
        in_specs=[pl.BlockSpec((tile_m, H), lambda i: (i, 0)),
                  pl.BlockSpec((1, H), lambda i: (0, 0)),
                  pl.BlockSpec((1, H), lambda i: (0, 0))],
        out_specs=pl.BlockSpec((tile_m, H), lambda i: (i, 0)),
        compiler_params=_cparams("parallel"),
    )(x, g, b)


def matmul_bias(x, w, b, *, tile_m, tile_n=None, out_dtype=None):
    """out = x @ w + b, tiled over rows (and optionally output columns)."""
    M, K = x.shape
    N = w.shape[1]
    out_dtype = x.dtype if out_dtype is None else out_dtype
    if tile_n is None:
        grid = (M // tile_m,)
        in_specs = [pl.BlockSpec((tile_m, K), lambda i: (i, 0)),
                    pl.BlockSpec((K, N), lambda i: (0, 0)),
                    pl.BlockSpec((1, N), lambda i: (0, 0))]
        out_specs = pl.BlockSpec((tile_m, N), lambda i: (i, 0))
        sem = ("parallel",)
    else:
        grid = (M // tile_m, N // tile_n)
        in_specs = [pl.BlockSpec((tile_m, K), lambda i, j: (i, 0)),
                    pl.BlockSpec((K, tile_n), lambda i, j: (0, j)),
                    pl.BlockSpec((1, tile_n), lambda i, j: (0, j))]
        out_specs = pl.BlockSpec((tile_m, tile_n), lambda i, j: (i, j))
        sem = ("parallel", "parallel")
    return pl.pallas_call(
        _matmul_bias_kernel,
        out_shape=jax.ShapeDtypeStruct((M, N), out_dtype),
        grid=grid, in_specs=in_specs, out_specs=out_specs,
        compiler_params=_cparams(*sem),
    )(x, w, b)


def mlm_transform(x, w, b, g, be, *, tile_m, eps=1e-12):
    M, H = x.shape
    return pl.pallas_call(
        functools.partial(_mlm_transform_kernel, eps=eps),
        out_shape=jax.ShapeDtypeStruct((M, H), x.dtype),
        grid=(M // tile_m,),
        in_specs=[pl.BlockSpec((tile_m, H), lambda i: (i, 0)),
                  pl.BlockSpec((H, H), lambda i: (0, 0)),
                  pl.BlockSpec((1, H), lambda i: (0, 0)),
                  pl.BlockSpec((1, H), lambda i: (0, 0)),
                  pl.BlockSpec((1, H), lambda i: (0, 0))],
        out_specs=pl.BlockSpec((tile_m, H), lambda i: (i, 0)),
        compiler_params=_cparams("parallel"),
    )(x, w, b, g, be)


def attention_ffn_layer(x, qh, kh, vh, key_bias, layer, *, batch, seq, tile_q, eps=1e-12):
    """x: (B*S, H) bf16 residual; qh/kh/vh: (B*nH, S, Dh) bf16; key_bias: (B, 1, S) f32."""
    M, H = x.shape
    nH = qh.shape[0] // batch
    Dh = H // nH
    FF = layer["wff1"].shape[1]
    n_qt = seq // tile_q
    row_map = lambda b, i: (b * n_qt + i, 0)         # flat-token tile for batch b, tile i
    full2 = lambda b, i: (0, 0)                      # grid-invariant weights (no re-DMA)
    return pl.pallas_call(
        functools.partial(_attn_ffn_kernel, eps=eps),
        out_shape=jax.ShapeDtypeStruct((M, H), x.dtype),
        grid=(batch, n_qt),
        in_specs=[
            pl.BlockSpec((tile_q, H), row_map),                      # residual x tile
            pl.BlockSpec((nH, tile_q, Dh), lambda b, i: (b, i, 0)),  # q tile (all heads)
            pl.BlockSpec((nH, seq, Dh), lambda b, i: (b, 0, 0)),     # full K for batch b
            pl.BlockSpec((nH, seq, Dh), lambda b, i: (b, 0, 0)),     # full V for batch b
            pl.BlockSpec((1, 1, seq), lambda b, i: (b, 0, 0)),       # additive key mask
            pl.BlockSpec((H, H), full2),                             # out_lin weight
            pl.BlockSpec((1, H), full2),                             # out_lin bias
            pl.BlockSpec((1, H), full2),                             # sa_ln gamma
            pl.BlockSpec((1, H), full2),                             # sa_ln beta
            pl.BlockSpec((H, FF), full2),                            # ffn lin1 weight
            pl.BlockSpec((1, FF), full2),                            # ffn lin1 bias
            pl.BlockSpec((FF, H), full2),                            # ffn lin2 weight
            pl.BlockSpec((1, H), full2),                             # ffn lin2 bias
            pl.BlockSpec((1, H), full2),                             # out_ln gamma
            pl.BlockSpec((1, H), full2),                             # out_ln beta
        ],
        out_specs=pl.BlockSpec((tile_q, H), row_map),
        scratch_shapes=[pltpu.VMEM((tile_q, H), x.dtype)],           # merged-head context
        compiler_params=_cparams("parallel", "parallel"),
    )(x, qh, kh, vh, key_bias,
      layer["wo"], layer["bo"], layer["sa_ln_g"], layer["sa_ln_b"],
      layer["wff1"], layer["bff1"], layer["wff2"], layer["bff2"],
      layer["out_ln_g"], layer["out_ln_b"])


# ---------------------------------------------------------------------------
# Model forward (glue in plain JAX, hot paths in Pallas)
# ---------------------------------------------------------------------------

def _build_key_bias(attention_mask, B, S):
    """Tiny (B, 1, S) additive key mask (0 keep / -1e30 masked) instead of an (M, M) bias."""
    if attention_mask is None:
        return jnp.zeros((B, 1, S), jnp.float32)
    keep = attention_mask.astype(bool).reshape(B, 1, S)
    return jnp.where(keep, 0.0, -1e30).astype(jnp.float32)


def distilbert_forward(prep, input_ids, attention_mask=None, *,
                       tile_target=_DEFAULT_TILE, logits_dtype=jnp.float32):
    B, S = input_ids.shape
    H = prep["word_embeddings"].shape[1]
    nH = prep["n_heads"]
    Dh = H // nH
    V = prep["vocab_size"]
    max_pos = prep["position_embeddings"].shape[0]
    assert S <= max_pos, f"sequence length {S} exceeds max position embeddings {max_pos}"
    M = B * S
    tile_m = _fit_tile(M, tile_target)
    tile_q = _fit_tile(S, tile_target)

    # embeddings (token-id gather stays in plain JAX)
    x = prep["word_embeddings"][input_ids] + prep["position_embeddings"][:S][None, :, :]
    x2 = x.reshape(M, H)
    x2 = embed_layernorm(x2, prep["emb_ln_g"], prep["emb_ln_b"], tile_m=tile_m)

    key_bias = _build_key_bias(attention_mask, B, S)

    def to_heads(t):  # (M, H) -> (B*nH, S, Dh) head-major layout for batched attention
        return t.reshape(B, S, nH, Dh).transpose(0, 2, 1, 3).reshape(B * nH, S, Dh)

    # TODO(synk): for v5e, stream the next layer's weights with a cross-call DMA future
    # (or fuse all layers into one pallas_call with pltpu.emit_pipeline) to avoid the
    # per-layer activation round-trip through HBM.
    for layer in prep["layers"]:
        qkv = matmul_bias(x2, layer["wqkv"], layer["bqkv"], tile_m=tile_m)   # (M, 3H) bf16
        q, k, v = jnp.split(qkv, 3, axis=1)
        x2 = attention_ffn_layer(x2, to_heads(q), to_heads(k), to_heads(v), key_bias,
                                 layer, batch=B, seq=S, tile_q=tile_q)

    # MLM head
    h = mlm_transform(x2, prep["vt_w"], prep["vt_b"], prep["v_ln_g"], prep["v_ln_b"],
                      tile_m=tile_m)
    logits = matmul_bias(h, prep["vp_w"], prep["vp_b"], tile_m=tile_m,
                         tile_n=prep["vocab_tile"], out_dtype=logits_dtype)
    return logits[:, :V].reshape(B, S, V)


# ---------------------------------------------------------------------------
# Deterministic parameter construction (synthetic, PyTorch nn.Linear layouts)
# ---------------------------------------------------------------------------

def init_params(key, *, vocab_size=128, max_pos=16, dim=32, n_heads=4,
                hidden_dim=64, n_layers=6):
    keys = iter(jax.random.split(key, 8 + n_layers * 16))

    def w(shape):
        return (0.02 * jax.random.normal(next(keys), shape)).astype(jnp.float32)

    def zeros(shape):
        return jnp.zeros(shape, jnp.float32)

    def ones(shape):
        return jnp.ones(shape, jnp.float32)

    params = {
        "config": dict(vocab_size=vocab_size, dim=dim, n_heads=n_heads,
                       hidden_dim=hidden_dim, n_layers=n_layers, max_pos=max_pos),
        "embeddings": {
            "word_embeddings": w((vocab_size, dim)),
            "position_embeddings": w((max_pos, dim)),
            "ln_g": ones((dim,)), "ln_b": zeros((dim,)),
        },
        "layers": [],
        "vocab_transform_w": w((dim, dim)), "vocab_transform_b": zeros((dim,)),
        "vocab_ln_g": ones((dim,)), "vocab_ln_b": zeros((dim,)),
        "vocab_proj_w": w((vocab_size, dim)), "vocab_proj_b": zeros((vocab_size,)),
    }
    for _ in range(n_layers):
        params["layers"].append({
            "q_w": w((dim, dim)), "q_b": zeros((dim,)),
            "k_w": w((dim, dim)), "k_b": zeros((dim,)),
            "v_w": w((dim, dim)), "v_b": zeros((dim,)),
            "o_w": w((dim, dim)), "o_b": zeros((dim,)),
            "sa_ln_g": ones((dim,)), "sa_ln_b": zeros((dim,)),
            "ffn1_w": w((hidden_dim, dim)), "ffn1_b": zeros((hidden_dim,)),
            "ffn2_w": w((dim, hidden_dim)), "ffn2_b": zeros((dim,)),
            "out_ln_g": ones((dim,)), "out_ln_b": zeros((dim,)),
        })
    return params


def prepare_params(params, dtype=jnp.bfloat16, vocab_tile=512):
    """One-time layout/dtype prep: transpose to (K, N), fuse QKV, fold softmax scale,
    reshape biases to (1, N), pad vocab to a tile multiple, cast matmul operands to bf16
    (biases / LayerNorm params stay f32)."""
    cfg = params["config"]
    H, nH, V = cfg["dim"], cfg["n_heads"], cfg["vocab_size"]
    Dh = H // nH
    scale = 1.0 / math.sqrt(Dh)
    emb = params["embeddings"]

    tile_v = vocab_tile if V >= vocab_tile else _round_up(V, 128)
    Vp = _round_up(V, tile_v)
    vp_w = jnp.pad(params["vocab_proj_w"].T, ((0, 0), (0, Vp - V)))      # (H, Vp)
    vp_b = jnp.pad(params["vocab_proj_b"], (0, Vp - V))                  # (Vp,)

    prep = {
        "n_heads": nH,
        "vocab_size": V,
        "vocab_tile": tile_v,
        "word_embeddings": emb["word_embeddings"].astype(dtype),
        "position_embeddings": emb["position_embeddings"].astype(dtype),
        "emb_ln_g": emb["ln_g"].reshape(1, H).astype(jnp.float32),
        "emb_ln_b": emb["ln_b"].reshape(1, H).astype(jnp.float32),
        "layers": [],
        "vt_w": params["vocab_transform_w"].T.astype(dtype),             # (H, H)
        "vt_b": params["vocab_transform_b"].reshape(1, H).astype(jnp.float32),
        "v_ln_g": params["vocab_ln_g"].reshape(1, H).astype(jnp.float32),
        "v_ln_b": params["vocab_ln_b"].reshape(1, H).astype(jnp.float32),
        "vp_w": vp_w.astype(dtype),                                      # (H, Vp)
        "vp_b": vp_b.reshape(1, Vp).astype(jnp.float32),
    }
    for layer in params["layers"]:
        wqkv = jnp.concatenate(
            [layer["q_w"].T * scale, layer["k_w"].T, layer["v_w"].T], axis=1)   # (H, 3H)
        bqkv = jnp.concatenate(
            [layer["q_b"] * scale, layer["k_b"], layer["v_b"]]).reshape(1, 3 * H)
        prep["layers"].append({
            "wqkv": wqkv.astype(dtype),
            "bqkv": bqkv.astype(jnp.float32),
            "wo": layer["o_w"].T.astype(dtype),                          # (H, H) single matmul
            "bo": layer["o_b"].reshape(1, H).astype(jnp.float32),
            "sa_ln_g": layer["sa_ln_g"].reshape(1, H).astype(jnp.float32),
            "sa_ln_b": layer["sa_ln_b"].reshape(1, H).astype(jnp.float32),
            "wff1": layer["ffn1_w"].T.astype(dtype),                     # (H, hidden)
            "bff1": layer["ffn1_b"].reshape(1, -1).astype(jnp.float32),
            "wff2": layer["ffn2_w"].T.astype(dtype),                     # (hidden, H)
            "bff2": layer["ffn2_b"].reshape(1, H).astype(jnp.float32),
            "out_ln_g": layer["out_ln_g"].reshape(1, H).astype(jnp.float32),
            "out_ln_b": layer["out_ln_b"].reshape(1, H).astype(jnp.float32),
        })
    return prep


if __name__ == "__main__":
    key = jax.random.PRNGKey(0)
    pkey, dkey = jax.random.split(key)

    B, S = 2, 8
    params = init_params(pkey, vocab_size=128, max_pos=16, dim=32,
                         n_heads=4, hidden_dim=64, n_layers=6)
    prep = prepare_params(params)

    input_ids = jax.random.randint(dkey, (B, S), 0, params["config"]["vocab_size"],
                                   dtype=jnp.int32)
    # mask the last key position of the second sequence (exercises attention masking)
    attention_mask = jnp.ones((B, S), jnp.int32).at[1, S - 1].set(0)

    fwd = jax.jit(lambda ids, mask: distilbert_forward(prep, ids, mask))
    logits = jax.block_until_ready(fwd(input_ids, attention_mask))

    assert logits.shape == (B, S, params["config"]["vocab_size"]), logits.shape
    assert bool(jnp.all(jnp.isfinite(logits)))
    print("KERNEL_OK")
</pallas_src>

<mosaic_0001>
module attributes {stable_mosaic.version = 11 : i64} {
  func.func @_embed_ln_kernel(%arg0: i32, %arg1: memref<16x32xbf16, #tpu.memory_space<vmem>>, %arg2: memref<1x32xf32, #tpu.memory_space<vmem>>, %arg3: memref<1x32xf32, #tpu.memory_space<vmem>>, %arg4: memref<16x32xbf16, #tpu.memory_space<vmem>>) attributes {dimension_semantics = [#tpu.dimension_semantics<parallel>], iteration_bounds = array<i64: 1>, scalar_prefetch = 0 : i64, scratch_operands = 0 : i64, tpu.core_type = #tpu.core_type<tc>, window_params = [{transform_indices = @transform_0, window_bounds = array<i64: 16, 32>}, {pipeline_mode = #tpu.pipeline_mode<synchronous>, transform_indices = @transform_1, window_bounds = array<i64: 1, 32>}, {pipeline_mode = #tpu.pipeline_mode<synchronous>, transform_indices = @transform_2, window_bounds = array<i64: 1, 32>}, {transform_indices = @transform_3, window_bounds = array<i64: 16, 32>}]} {
    %c0 = arith.constant 0 : index
    %c0_0 = arith.constant 0 : index
    %0 = vector.load %arg1[%c0, %c0_0] : memref<16x32xbf16, #tpu.memory_space<vmem>>, vector<16x32xbf16>
    %1 = arith.extf %0 : vector<16x32xbf16> to vector<16x32xf32>
    %c0_1 = arith.constant 0 : index
    %c0_2 = arith.constant 0 : index
    %2 = vector.load %arg2[%c0_1, %c0_2] : memref<1x32xf32, #tpu.memory_space<vmem>>, vector<1x32xf32>
    %c0_3 = arith.constant 0 : index
    %c0_4 = arith.constant 0 : index
    %3 = vector.load %arg3[%c0_3, %c0_4] : memref<1x32xf32, #tpu.memory_space<vmem>>, vector<1x32xf32>
    %cst = arith.constant dense<0.000000e+00> : vector<16xf32>
    %4 = vector.multi_reduction <add>, %1, %cst [1] : vector<16x32xf32> to vector<16xf32>
    %5 = vector.shape_cast %4 : vector<16xf32> to vector<16x1xf32>
    %cst_5 = arith.constant 3.200000e+01 : f32
    %6 = vector.broadcast %cst_5 : f32 to vector<16x1xf32>
    %7 = arith.divf %5, %6 : vector<16x1xf32>
    %8 = vector.broadcast %7 : vector<16x1xf32> to vector<16x32xf32>
    %9 = arith.subf %1, %8 : vector<16x32xf32>
    %10 = arith.mulf %9, %9 : vector<16x32xf32>
    %cst_6 = arith.constant dense<0.000000e+00> : vector<16xf32>
    %11 = vector.multi_reduction <add>, %10, %cst_6 [1] : vector<16x32xf32> to vector<16xf32>
    %12 = vector.shape_cast %11 : vector<16xf32> to vector<16x1xf32>
    %cst_7 = arith.constant 3.200000e+01 : f32
    %13 = vector.broadcast %cst_7 : f32 to vector<16x1xf32>
    %14 = arith.divf %12, %13 : vector<16x1xf32>
    %cst_8 = arith.constant 9.99999996E-13 : f32
    %15 = vector.broadcast %cst_8 : f32 to vector<16x1xf32>
    %16 = arith.addf %14, %15 : vector<16x1xf32>
    %17 = math.rsqrt %16 : vector<16x1xf32>
    %18 = vector.broadcast %17 : vector<16x1xf32> to vector<16x32xf32>
    %19 = arith.mulf %9, %18 : vector<16x32xf32>
    %20 = vector.broadcast %2 : vector<1x32xf32> to vector<16x32xf32>
    %21 = arith.mulf %19, %20 : vector<16x32xf32>
    %22 = vector.broadcast %3 : vector<1x32xf32> to vector<16x32xf32>
    %23 = arith.addf %21, %22 : vector<16x32xf32>
    %24 = arith.truncf %23 : vector<16x32xf32> to vector<16x32xbf16>
    %c0_9 = arith.constant 0 : index
    %c0_10 = arith.constant 0 : index
    %25 = vector.load %arg4[%c0_9, %c0_10] : memref<16x32xbf16, #tpu.memory_space<vmem>>, vector<16x32xbf16>
    tpu.vector_store %arg4[%c0_9, %c0_10], %24 {strides = array<i32>} : memref<16x32xbf16, #tpu.memory_space<vmem>>, vector<16x32xbf16>,
    return
  }
  func.func @transform_0(%arg0: i32) -> (i32, i32) {
    %c0_i32 = arith.constant 0 : i32
    %c0_i32_0 = arith.constant 0 : i32
    return %arg0, %c0_i32 : i32, i32
  }
  func.func @transform_1(%arg0: i32) -> (i32, i32) {
    %c0_i32 = arith.constant 0 : i32
    %c0_i32_0 = arith.constant 0 : i32
    %c0_i32_1 = arith.constant 0 : i32
    return %c0_i32, %c0_i32_0 : i32, i32
  }
  func.func @transform_2(%arg0: i32) -> (i32, i32) {
    %c0_i32 = arith.constant 0 : i32
    %c0_i32_0 = arith.constant 0 : i32
    %c0_i32_1 = arith.constant 0 : i32
    return %c0_i32, %c0_i32_0 : i32, i32
  }
  func.func @transform_3(%arg0: i32) -> (i32, i32) {
    %c0_i32 = arith.constant 0 : i32
    %c0_i32_0 = arith.constant 0 : i32
    return %arg0, %c0_i32 : i32, i32
  }
}

module attributes {stable_mosaic.version = 11 : i64} {
  func.func @_matmul_bias_kernel(%arg0: i32, %arg1: memref<16x32xbf16, #tpu.memory_space<vmem>>, %arg2: memref<32x96xbf16, #tpu.memory_space<vmem>>, %arg3: memref<1x96xf32, #tpu.memory_space<vmem>>, %arg4: memref<16x96xbf16, #tpu.memory_space<vmem>>) attributes {dimension_semantics = [#tpu.dimension_semantics<parallel>], iteration_bounds = array<i64: 1>, scalar_prefetch = 0 : i64, scratch_operands = 0 : i64, tpu.core_type = #tpu.core_type<tc>, window_params = [{transform_indices = @transform_0, window_bounds = array<i64: 16, 32>}, {pipeline_mode = #tpu.pipeline_mode<synchronous>, transform_indices = @transform_1, window_bounds = array<i64: 32, 96>}, {pipeline_mode = #tpu.pipeline_mode<synchronous>, transform_indices = @transform_2, window_bounds = array<i64: 1, 96>}, {transform_indices = @transform_3, window_bounds = array<i64: 16, 96>}]} {
    %c0 = arith.constant 0 : index
    %c0_0 = arith.constant 0 : index
    %0 = vector.load %arg1[%c0, %c0_0] : memref<16x32xbf16, #tpu.memory_space<vmem>>, vector<16x32xbf16>
    %c0_1 = arith.constant 0 : index
    %c0_2 = arith.constant 0 : index
    %1 = vector.load %arg2[%c0_1, %c0_2] : memref<32x96xbf16, #tpu.memory_space<vmem>>, vector<32x96xbf16>
    %cst = arith.constant dense<0.000000e+00> : vector<16x96xf32>
    %2 = tpu.matmul %0, %1, %cst {dimension_numbers = #tpu.dot_dimension_numbers<[1], [0], [0], [1], [0, 0, 1, 1], [], []>} : vector<16x32xbf16>, vector<32x96xbf16>, vector<16x96xf32> -> vector<16x96xf32>
    %c0_3 = arith.constant 0 : index
    %c0_4 = arith.constant 0 : index
    %3 = vector.load %arg3[%c0_3, %c0_4] : memref<1x96xf32, #tpu.memory_space<vmem>>, vector<1x96xf32>
    %4 = vector.broadcast %3 : vector<1x96xf32> to vector<16x96xf32>
    %5 = arith.addf %2, %4 : vector<16x96xf32>
    %6 = arith.truncf %5 : vector<16x96xf32> to vector<16x96xbf16>
    %c0_5 = arith.constant 0 : index
    %c0_6 = arith.constant 0 : index
    %7 = vector.load %arg4[%c0_5, %c0_6] : memref<16x96xbf16, #tpu.memory_space<vmem>>, vector<16x96xbf16>
    tpu.vector_store %arg4[%c0_5, %c0_6], %6 {strides = array<i32>} : memref<16x96xbf16, #tpu.memory_space<vmem>>, vector<16x96xbf16>,
    return
  }
  func.func @transform_0(%arg0: i32) -> (i32, i32) {
    %c0_i32 = arith.constant 0 : i32
    %c0_i32_0 = arith.constant 0 : i32
    return %arg0, %c0_i32 : i32, i32
  }
  func.func @transform_1(%arg0: i32) -> (i32, i32) {
    %c0_i32 = arith.constant 0 : i32
    %c0_i32_0 = arith.constant 0 : i32
    %c0_i32_1 = arith.constant 0 : i32
    return %c0_i32, %c0_i32_0 : i32, i32
  }
  func.func @transform_2(%arg0: i32) -> (i32, i32) {
    %c0_i32 = arith.constant 0 : i32
    %c0_i32_0 = arith.constant 0 : i32
    %c0_i32_1 = arith.constant 0 : i32
    return %c0_i32, %c0_i32_0 : i32, i32
  }
  func.func @transform_3(%arg0: i32) -> (i32, i32) {
    %c0_i32 = arith.constant 0 : i32
    %c0_i32_0 = arith.constant 0 : i32
    return %arg0, %c0_i32 : i32, i32
  }
}

module attributes {stable_mosaic.version = 11 : i64} {
  func.func @_mlm_transform_kernel(%arg0: i32, %arg1: memref<16x32xbf16, #tpu.memory_space<vmem>>, %arg2: memref<32x32xbf16, #tpu.memory_space<vmem>>, %arg3: memref<1x32xf32, #tpu.memory_space<vmem>>, %arg4: memref<1x32xf32, #tpu.memory_space<vmem>>, %arg5: memref<1x32xf32, #tpu.memory_space<vmem>>, %arg6: memref<16x32xbf16, #tpu.memory_space<vmem>>) attributes {dimension_semantics = [#tpu.dimension_semantics<parallel>], iteration_bounds = array<i64: 1>, scalar_prefetch = 0 : i64, scratch_operands = 0 : i64, tpu.core_type = #tpu.core_type<tc>, window_params = [{transform_indices = @transform_0, window_bounds = array<i64: 16, 32>}, {pipeline_mode = #tpu.pipeline_mode<synchronous>, transform_indices = @transform_1, window_bounds = array<i64: 32, 32>}, {pipeline_mode = #tpu.pipeline_mode<synchronous>, transform_indices = @transform_2, window_bounds = array<i64: 1, 32>}, {pipeline_mode = #tpu.pipeline_mode<synchronous>, transform_indices = @transform_3, window_bounds = array<i64: 1, 32>}, {pipeline_mode = #tpu.pipeline_mode<synchronous>, transform_indices = @transform_4, window_bounds = array<i64: 1, 32>}, {transform_indices = @transform_5, window_bounds = array<i64: 16, 32>}]} {
    %c0 = arith.constant 0 : index
    %c0_0 = arith.constant 0 : index
    %0 = vector.load %arg1[%c0, %c0_0] : memref<16x32xbf16, #tpu.memory_space<vmem>>, vector<16x32xbf16>
    %c0_1 = arith.constant 0 : index
    %c0_2 = arith.constant 0 : index
    %1 = vector.load %arg2[%c0_1, %c0_2] : memref<32x32xbf16, #tpu.memory_space<vmem>>, vector<32x32xbf16>
    %cst = arith.constant dense<0.000000e+00> : vector<16x32xf32>
    %2 = tpu.matmul %0, %1, %cst {dimension_numbers = #tpu.dot_dimension_numbers<[1], [0], [0], [1], [0, 0, 1, 1], [], []>} : vector<16x32xbf16>, vector<32x32xbf16>, vector<16x32xf32> -> vector<16x32xf32>
    %c0_3 = arith.constant 0 : index
    %c0_4 = arith.constant 0 : index
    %3 = vector.load %arg3[%c0_3, %c0_4] : memref<1x32xf32, #tpu.memory_space<vmem>>, vector<1x32xf32>
    %4 = vector.broadcast %3 : vector<1x32xf32> to vector<16x32xf32>
    %5 = arith.addf %2, %4 : vector<16x32xf32>
    %cst_5 = arith.constant 5.000000e-01 : f32
    %6 = vector.broadcast %cst_5 : f32 to vector<16x32xf32>
    %7 = arith.mulf %6, %5 : vector<16x32xf32>
    %8 = arith.mulf %5, %5 : vector<16x32xf32>
    %9 = arith.mulf %8, %5 : vector<16x32xf32>
    %cst_6 = arith.constant 4.471500e-02 : f32
    %10 = vector.broadcast %cst_6 : f32 to vector<16x32xf32>
    %11 = arith.mulf %10, %9 : vector<16x32xf32>
    %12 = arith.addf %5, %11 : vector<16x32xf32>
    %cst_7 = arith.constant 0.797884583 : f32
    %13 = vector.broadcast %cst_7 : f32 to vector<16x32xf32>
    %14 = arith.mulf %13, %12 : vector<16x32xf32>
    %15 = math.tanh %14 : vector<16x32xf32>
    %cst_8 = arith.constant 1.000000e+00 : f32
    %16 = vector.broadcast %cst_8 : f32 to vector<16x32xf32>
    %17 = arith.addf %16, %15 : vector<16x32xf32>
    %18 = arith.mulf %7, %17 : vector<16x32xf32>
    %c0_9 = arith.constant 0 : index
    %c0_10 = arith.constant 0 : index
    %19 = vector.load %arg4[%c0_9, %c0_10] : memref<1x32xf32, #tpu.memory_space<vmem>>, vector<1x32xf32>
    %c0_11 = arith.constant 0 : index
    %c0_12 = arith.constant 0 : index
    %20 = vector.load %arg5[%c0_11, %c0_12] : memref<1x32xf32, #tpu.memory_space<vmem>>, vector<1x32xf32>
    %cst_13 = arith.constant dense<0.000000e+00> : vector<16xf32>
    %21 = vector.multi_reduction <add>, %18, %cst_13 [1] : vector<16x32xf32> to vector<16xf32>
    %22 = vector.shape_cast %21 : vector<16xf32> to vector<16x1xf32>
    %cst_14 = arith.constant 3.200000e+01 : f32
    %23 = vector.broadcast %cst_14 : f32 to vector<16x1xf32>
    %24 = arith.divf %22, %23 : vector<16x1xf32>
    %25 = vector.broadcast %24 : vector<16x1xf32> to vector<16x32xf32>
    %26 = arith.subf %18, %25 : vector<16x32xf32>
    %27 = arith.mulf %26, %26 : vector<16x32xf32>
    %cst_15 = arith.constant dense<0.000000e+00> : vector<16xf32>
    %28 = vector.multi_reduction <add>, %27, %cst_15 [1] : vector<16x32xf32> to vector<16xf32>
    %29 = vector.shape_cast %28 : vector<16xf32> to vector<16x1xf32>
    %cst_16 = arith.constant 3.200000e+01 : f32
    %30 = vector.broadcast %cst_16 : f32 to vector<16x1xf32>
    %31 = arith.divf %29, %30 : vector<16x1xf32>
    %cst_17 = arith.constant 9.99999996E-13 : f32
    %32 = vector.broadcast %cst_17 : f32 to vector<16x1xf32>
    %33 = arith.addf %31, %32 : vector<16x1xf32>
    %34 = math.rsqrt %33 : vector<16x1xf32>
    %35 = vector.broadcast %34 : vector<16x1xf32> to vector<16x32xf32>
    %36 = arith.mulf %26, %35 : vector<16x32xf32>
    %37 = vector.broadcast %19 : vector<1x32xf32> to vector<16x32xf32>
    %38 = arith.mulf %36, %37 : vector<16x32xf32>
    %39 = vector.broadcast %20 : vector<1x32xf32> to vector<16x32xf32>
    %40 = arith.addf %38, %39 : vector<16x32xf32>
    %41 = arith.truncf %40 : vector<16x32xf32> to vector<16x32xbf16>
    %c0_18 = arith.constant 0 : index
    %c0_19 = arith.constant 0 : index
    %42 = vector.load %arg6[%c0_18, %c0_19] : memref<16x32xbf16, #tpu.memory_space<vmem>>, vector<16x32xbf16>
    tpu.vector_store %arg6[%c0_18, %c0_19], %41 {strides = array<i32>} : memref<16x32xbf16, #tpu.memory_space<vmem>>, vector<16x32xbf16>,
    return
  }
  func.func @transform_0(%arg0: i32) -> (i32, i32) {
    %c0_i32 = arith.constant 0 : i32
    %c0_i32_0 = arith.constant 0 : i32
    return %arg0, %c0_i32 : i32, i32
  }
  func.func @transform_1(%arg0: i32) -> (i32, i32) {
    %c0_i32 = arith.constant 0 : i32
    %c0_i32_0 = arith.constant 0 : i32
    %c0_i32_1 = arith.constant 0 : i32
    return %c0_i32, %c0_i32_0 : i32, i32
  }
  func.func @transform_2(%arg0: i32) -> (i32, i32) {
    %c0_i32 = arith.constant 0 : i32
    %c0_i32_0 = arith.constant 0 : i32
    %c0_i32_1 = arith.constant 0 : i32
    return %c0_i32, %c0_i32_0 : i32, i32
  }
  func.func @transform_3(%arg0: i32) -> (i32, i32) {
    %c0_i32 = arith.constant 0 : i32
    %c0_i32_0 = arith.constant 0 : i32
    %c0_i32_1 = arith.constant 0 : i32
    return %c0_i32, %c0_i32_0 : i32, i32
  }
  func.func @transform_4(%arg0: i32) -> (i32, i32) {
    %c0_i32 = arith.constant 0 : i32
    %c0_i32_0 = arith.constant 0 : i32
    %c0_i32_1 = arith.constant 0 : i32
    return %c0_i32, %c0_i32_0 : i32, i32
  }
  func.func @transform_5(%arg0: i32) -> (i32, i32) {
    %c0_i32 = arith.constant 0 : i32
    %c0_i32_0 = arith.constant 0 : i32
    return %arg0, %c0_i32 : i32, i32
  }
}

module attributes {stable_mosaic.version = 11 : i64} {
  func.func @_attn_ffn_kernel(%arg0: i32, %arg1: i32, %arg2: memref<8x32xbf16, #tpu.memory_space<vmem>>, %arg3: memref<4x8x8xbf16, #tpu.memory_space<vmem>>, %arg4: memref<4x8x8xbf16, #tpu.memory_space<vmem>>, %arg5: memref<4x8x8xbf16, #tpu.memory_space<vmem>>, %arg6: memref<1x1x8xf32, #tpu.memory_space<vmem>>, %arg7: memref<32x32xbf16, #tpu.memory_space<vmem>>, %arg8: memref<1x32xf32, #tpu.memory_space<vmem>>, %arg9: memref<1x32xf32, #tpu.memory_space<vmem>>, %arg10: memref<1x32xf32, #tpu.memory_space<vmem>>, %arg11: memref<32x64xbf16, #tpu.memory_space<vmem>>, %arg12: memref<1x64xf32, #tpu.memory_space<vmem>>, %arg13: memref<64x32xbf16, #tpu.memory_space<vmem>>, %arg14: memref<1x32xf32, #tpu.memory_space<vmem>>, %arg15: memref<1x32xf32, #tpu.memory_space<vmem>>, %arg16: memref<1x32xf32, #tpu.memory_space<vmem>>, %arg17: memref<8x32xbf16, #tpu.memory_space<vmem>>, %arg18: memref<8x32xbf16, #tpu.memory_space<vmem>>) attributes {dimension_semantics = [#tpu.dimension_semantics<parallel>, #tpu.dimension_semantics<parallel>], iteration_bounds = array<i64: 2, 1>, scalar_prefetch = 0 : i64, scratch_operands = 1 : i64, tpu.core_type = #tpu.core_type<tc>, window_params = [{transform_indices = @transform_0, window_bounds = array<i64: 8, 32>}, {transform_indices = @transform_1, window_bounds = array<i64: 4, 8, 8>}, {transform_indices = @transform_2, window_bounds = array<i64: 4, 8, 8>}, {transform_indices = @transform_3, window_bounds = array<i64: 4, 8, 8>}, {transform_indices = @transform_4, window_bounds = array<i64: 1, 1, 8>}, {pipeline_mode = #tpu.pipeline_mode<synchronous>, transform_indices = @transform_5, window_bounds = array<i64: 32, 32>}, {pipeline_mode = #tpu.pipeline_mode<synchronous>, transform_indices = @transform_6, window_bounds = array<i64: 1, 32>}, {pipeline_mode = #tpu.pipeline_mode<synchronous>, transform_indices = @transform_7, window_bounds = array<i64: 1, 32>}, {pipeline_mode = #tpu.pipeline_mode<synchronous>, transform_indices = @transform_8, window_bounds = array<i64: 1, 32>}, {pipeline_mode = #tpu.pipeline_mode<synchronous>, transform_indices = @transform_9, window_bounds = array<i64: 32, 64>}, {pipeline_mode = #tpu.pipeline_mode<synchronous>, transform_indices = @transform_10, window_bounds = array<i64: 1, 64>}, {pipeline_mode = #tpu.pipeline_mode<synchronous>, transform_indices = @transform_11, window_bounds = array<i64: 64, 32>}, {pipeline_mode = #tpu.pipeline_mode<synchronous>, transform_indices = @transform_12, window_bounds = array<i64: 1, 32>}, {pipeline_mode = #tpu.pipeline_mode<synchronous>, transform_indices = @transform_13, window_bounds = array<i64: 1, 32>}, {pipeline_mode = #tpu.pipeline_mode<synchronous>, transform_indices = @transform_14, window_bounds = array<i64: 1, 32>}, {transform_indices = @transform_15, window_bounds = array<i64: 8, 32>}]} {
    %c0 = arith.constant 0 : index
    %c0_0 = arith.constant 0 : index
    %c0_1 = arith.constant 0 : index
    %0 = vector.load %arg3[%c0, %c0_0, %c0_1] : memref<4x8x8xbf16, #tpu.memory_space<vmem>>, vector<4x8x8xbf16>
    %c0_2 = arith.constant 0 : index
    %c0_3 = arith.constant 0 : index
    %c0_4 = arith.constant 0 : index
    %1 = vector.load %arg4[%c0_2, %c0_3, %c0_4] : memref<4x8x8xbf16, #tpu.memory_space<vmem>>, vector<4x8x8xbf16>
    %c0_5 = arith.constant 0 : index
    %c0_6 = arith.constant 0 : index
    %c0_7 = arith.constant 0 : index
    %2 = vector.load %arg5[%c0_5, %c0_6, %c0_7] : memref<4x8x8xbf16, #tpu.memory_space<vmem>>, vector<4x8x8xbf16>
    "tpu.trace_start"() <{level = 10 : i32, message = "hqd,hkd->hqk"}> : () -> ()
    %cst = arith.constant dense<0.000000e+00> : vector<4x8x8xf32>
    %3 = tpu.matmul %0, %1, %cst {dimension_numbers = #tpu.dot_dimension_numbers<[2], [2], [1], [1], [0, 0, 0, 1, 1, 1], [0], [0]>} : vector<4x8x8xbf16>, vector<4x8x8xbf16>, vector<4x8x8xf32> -> vector<4x8x8xf32>
    "tpu.trace_stop"() : () -> ()
    %c0_8 = arith.constant 0 : index
    %c0_9 = arith.constant 0 : index
    %c0_10 = arith.constant 0 : index
    %4 = vector.load %arg6[%c0_8, %c0_9, %c0_10] : memref<1x1x8xf32, #tpu.memory_space<vmem>>, vector<1x1x8xf32>
    %5 = vector.broadcast %4 : vector<1x1x8xf32> to vector<4x8x8xf32>
    %6 = arith.addf %3, %5 : vector<4x8x8xf32>
    %cst_11 = arith.constant dense<0xFF800000> : vector<4x8xf32>
    %7 = vector.multi_reduction <maximumf>, %6, %cst_11 [2] : vector<4x8x8xf32> to vector<4x8xf32>
    %8 = vector.shape_cast %7 : vector<4x8xf32> to vector<4x8x1xf32>
    %9 = vector.broadcast %8 : vector<4x8x1xf32> to vector<4x8x8xf32>
    %10 = arith.subf %6, %9 : vector<4x8x8xf32>
    %11 = math.exp %10 : vector<4x8x8xf32>
    %cst_12 = arith.constant dense<0.000000e+00> : vector<4x8xf32>
    %12 = vector.multi_reduction <add>, %11, %cst_12 [2] : vector<4x8x8xf32> to vector<4x8xf32>
    %13 = vector.shape_cast %12 : vector<4x8xf32> to vector<4x8x1xf32>
    %14 = tpu.reciprocal %13 {approx = true} : vector<4x8x1xf32> -> vector<4x8x1xf32>
    %15 = vector.broadcast %14 : vector<4x8x1xf32> to vector<4x8x8xf32>
    %16 = arith.mulf %11, %15 : vector<4x8x8xf32>
    %17 = arith.truncf %16 : vector<4x8x8xf32> to vector<4x8x8xbf16>
    "tpu.trace_start"() <{level = 10 : i32, message = "hqk,hkd->hqd"}> : () -> ()
    %cst_13 = arith.constant dense<0.000000e+00> : vector<4x8x8xf32>
    %18 = tpu.matmul %17, %2, %cst_13 {dimension_numbers = #tpu.dot_dimension_numbers<[2], [1], [1], [2], [0, 0, 0, 1, 1, 2], [0], [0]>} : vector<4x8x8xbf16>, vector<4x8x8xbf16>, vector<4x8x8xf32> -> vector<4x8x8xf32>
    "tpu.trace_stop"() : () -> ()
    %19 = vector.extract_strided_slice %18 {offsets = [0, 0, 0], sizes = [1, 8, 8], strides = [1, 1, 1]} : vector<4x8x8xf32> to vector<1x8x8xf32>
    %20 = vector.shape_cast %19 : vector<1x8x8xf32> to vector<8x8xf32>
    %21 = arith.truncf %20 : vector<8x8xf32> to vector<8x8xbf16>
    %c0_14 = arith.constant 0 : index
    %c0_15 = arith.constant 0 : index
    %22 = vector.load %arg18[%c0_14, %c0_15] : memref<8x32xbf16, #tpu.memory_space<vmem>>, vector<8x8xbf16>
    tpu.vector_store %arg18[%c0_14, %c0_15], %21 {strides = array<i32>} : memref<8x32xbf16, #tpu.memory_space<vmem>>, vector<8x8xbf16>,
    %23 = vector.extract_strided_slice %18 {offsets = [1, 0, 0], sizes = [1, 8, 8], strides = [1, 1, 1]} : vector<4x8x8xf32> to vector<1x8x8xf32>
    %24 = vector.shape_cast %23 : vector<1x8x8xf32> to vector<8x8xf32>
    %25 = arith.truncf %24 : vector<8x8xf32> to vector<8x8xbf16>
    %c0_16 = arith.constant 0 : index
    %c8 = arith.constant 8 : index
    %26 = vector.load %arg18[%c0_16, %c8] : memref<8x32xbf16, #tpu.memory_space<vmem>>, vector<8x8xbf16>
    tpu.vector_store %arg18[%c0_16, %c8], %25 {strides = array<i32>} : memref<8x32xbf16, #tpu.memory_space<vmem>>, vector<8x8xbf16>,
    %27 = vector.extract_strided_slice %18 {offsets = [2, 0, 0], sizes = [1, 8, 8], strides = [1, 1, 1]} : vector<4x8x8xf32> to vector<1x8x8xf32>
    %28 = vector.shape_cast %27 : vector<1x8x8xf32> to vector<8x8xf32>
    %29 = arith.truncf %28 : vector<8x8xf32> to vector<8x8xbf16>
    %c0_17 = arith.constant 0 : index
    %c16 = arith.constant 16 : index
    %30 = vector.load %arg18[%c0_17, %c16] : memref<8x32xbf16, #tpu.memory_space<vmem>>, vector<8x8xbf16>
    tpu.vector_store %arg18[%c0_17, %c16], %29 {strides = array<i32>} : memref<8x32xbf16, #tpu.memory_space<vmem>>, vector<8x8xbf16>,
    %31 = vector.extract_strided_slice %18 {offsets = [3, 0, 0], sizes = [1, 8, 8], strides = [1, 1, 1]} : vector<4x8x8xf32> to vector<1x8x8xf32>
    %32 = vector.shape_cast %31 : vector<1x8x8xf32> to vector<8x8xf32>
    %33 = arith.truncf %32 : vector<8x8xf32> to vector<8x8xbf16>
    %c0_18 = arith.constant 0 : index
    %c24 = arith.constant 24 : index
    %34 = vector.load %arg18[%c0_18, %c24] : memref<8x32xbf16, #tpu.memory_space<vmem>>, vector<8x8xbf16>
    tpu.vector_store %arg18[%c0_18, %c24], %33 {strides = array<i32>} : memref<8x32xbf16, #tpu.memory_space<vmem>>, vector<8x8xbf16>,
    %c0_19 = arith.constant 0 : index
    %c0_20 = arith.constant 0 : index
    %35 = vector.load %arg2[%c0_19, %c0_20] : memref<8x32xbf16, #tpu.memory_space<vmem>>, vector<8x32xbf16>
    %36 = arith.extf %35 : vector<8x32xbf16> to vector<8x32xf32>
    %c0_21 = arith.constant 0 : index
    %c0_22 = arith.constant 0 : index
    %37 = vector.load %arg18[%c0_21, %c0_22] : memref<8x32xbf16, #tpu.memory_space<vmem>>, vector<8x32xbf16>
    %c0_23 = arith.constant 0 : index
    %c0_24 = arith.constant 0 : index
    %38 = vector.load %arg7[%c0_23, %c0_24] : memref<32x32xbf16, #tpu.memory_space<vmem>>, vector<32x32xbf16>
    %cst_25 = arith.constant dense<0.000000e+00> : vector<8x32xf32>
    %39 = tpu.matmul %37, %38, %cst_25 {dimension_numbers = #tpu.dot_dimension_numbers<[1], [0], [0], [1], [0, 0, 1, 1], [], []>} : vector<8x32xbf16>, vector<32x32xbf16>, vector<8x32xf32> -> vector<8x32xf32>
    %c0_26 = arith.constant 0 : index
    %c0_27 = arith.constant 0 : index
    %40 = vector.load %arg8[%c0_26, %c0_27] : memref<1x32xf32, #tpu.memory_space<vmem>>, vector<1x32xf32>
    %41 = vector.broadcast %40 : vector<1x32xf32> to vector<8x32xf32>
    %42 = arith.addf %39, %41 : vector<8x32xf32>
    %43 = arith.addf %42, %36 : vector<8x32xf32>
    %c0_28 = arith.constant 0 : index
    %c0_29 = arith.constant 0 : index
    %44 = vector.load %arg9[%c0_28, %c0_29] : memref<1x32xf32, #tpu.memory_space<vmem>>, vector<1x32xf32>
    %c0_30 = arith.constant 0 : index
    %c0_31 = arith.constant 0 : index
    %45 = vector.load %arg10[%c0_30, %c0_31] : memref<1x32xf32, #tpu.memory_space<vmem>>, vector<1x32xf32>
    %cst_32 = arith.constant dense<0.000000e+00> : vector<8xf32>
    %46 = vector.multi_reduction <add>, %43, %cst_32 [1] : vector<8x32xf32> to vector<8xf32>
    %47 = vector.shape_cast %46 : vector<8xf32> to vector<8x1xf32>
    %cst_33 = arith.constant 3.200000e+01 : f32
    %48 = vector.broadcast %cst_33 : f32 to vector<8x1xf32>
    %49 = arith.divf %47, %48 : vector<8x1xf32>
    %50 = vector.broadcast %49 : vector<8x1xf32> to vector<8x32xf32>
    %51 = arith.subf %43, %50 : vector<8x32xf32>
    %52 = arith.mulf %51, %51 : vector<8x32xf32>
    %cst_34 = arith.constant dense<0.000000e+00> : vector<8xf32>
    %53 = vector.multi_reduction <add>, %52, %cst_34 [1] : vector<8x32xf32> to vector<8xf32>
    %54 = vector.shape_cast %53 : vector<8xf32> to vector<8x1xf32>
    %cst_35 = arith.constant 3.200000e+01 : f32
    %55 = vector.broadcast %cst_35 : f32 to vector<8x1xf32>
    %56 = arith.divf %54, %55 : vector<8x1xf32>
    %cst_36 = arith.constant 9.99999996E-13 : f32
    %57 = vector.broadcast %cst_36 : f32 to vector<8x1xf32>
    %58 = arith.addf %56, %57 : vector<8x1xf32>
    %59 = math.rsqrt %58 : vector<8x1xf32>
    %60 = vector.broadcast %59 : vector<8x1xf32> to vector<8x32xf32>
    %61 = arith.mulf %51, %60 : vector<8x32xf32>
    %62 = vector.broadcast %44 : vector<1x32xf32> to vector<8x32xf32>
    %63 = arith.mulf %61, %62 : vector<8x32xf32>
    %64 = vector.broadcast %45 : vector<1x32xf32> to vector<8x32xf32>
    %65 = arith.addf %63, %64 : vector<8x32xf32>
    %66 = arith.truncf %65 : vector<8x32xf32> to vector<8x32xbf16>
    %c0_37 = arith.constant 0 : index
    %c0_38 = arith.constant 0 : index
    %67 = vector.load %arg11[%c0_37, %c0_38] : memref<32x64xbf16, #tpu.memory_space<vmem>>, vector<32x64xbf16>
    %cst_39 = arith.constant dense<0.000000e+00> : vector<8x64xf32>
    %68 = tpu.matmul %66, %67, %cst_39 {dimension_numbers = #tpu.dot_dimension_numbers<[1], [0], [0], [1], [0, 0, 1, 1], [], []>} : vector<8x32xbf16>, vector<32x64xbf16>, vector<8x64xf32> -> vector<8x64xf32>
    %c0_40 = arith.constant 0 : index
    %c0_41 = arith.constant 0 : index
    %69 = vector.load %arg12[%c0_40, %c0_41] : memref<1x64xf32, #tpu.memory_space<vmem>>, vector<1x64xf32>
    %70 = vector.broadcast %69 : vector<1x64xf32> to vector<8x64xf32>
    %71 = arith.addf %68, %70 : vector<8x64xf32>
    %cst_42 = arith.constant 5.000000e-01 : f32
    %72 = vector.broadcast %cst_42 : f32 to vector<8x64xf32>
    %73 = arith.mulf %72, %71 : vector<8x64xf32>
    %74 = arith.mulf %71, %71 : vector<8x64xf32>
    %75 = arith.mulf %74, %71 : vector<8x64xf32>
    %cst_43 = arith.constant 4.471500e-02 : f32
    %76 = vector.broadcast %cst_43 : f32 to vector<8x64xf32>
    %77 = arith.mulf %76, %75 : vector<8x64xf32>
    %78 = arith.addf %71, %77 : vector<8x64xf32>
    %cst_44 = arith.constant 0.797884583 : f32
    %79 = vector.broadcast %cst_44 : f32 to vector<8x64xf32>
    %80 = arith.mulf %79, %78 : vector<8x64xf32>
    %81 = math.tanh %80 : vector<8x64xf32>
    %cst_45 = arith.constant 1.000000e+00 : f32
    %82 = vector.broadcast %cst_45 : f32 to vector<8x64xf32>
    %83 = arith.addf %82, %81 : vector<8x64xf32>
    %84 = arith.mulf %73, %83 : vector<8x64xf32>
    %85 = arith.truncf %84 : vector<8x64xf32> to vector<8x64xbf16>
    %c0_46 = arith.constant 0 : index
    %c0_47 = arith.constant 0 : index
    %86 = vector.load %arg13[%c0_46, %c0_47] : memref<64x32xbf16, #tpu.memory_space<vmem>>, vector<64x32xbf16>
    %cst_48 = arith.constant dense<0.000000e+00> : vector<8x32xf32>
    %87 = tpu.matmul %85, %86, %cst_48 {dimension_numbers = #tpu.dot_dimension_numbers<[1], [0], [0], [1], [0, 0, 1, 1], [], []>} : vector<8x64xbf16>, vector<64x32xbf16>, vector<8x32xf32> -> vector<8x32xf32>
    %c0_49 = arith.constant 0 : index
    %c0_50 = arith.constant 0 : index
    %88 = vector.load %arg14[%c0_49, %c0_50] : memref<1x32xf32, #tpu.memory_space<vmem>>, vector<1x32xf32>
    %89 = vector.broadcast %88 : vector<1x32xf32> to vector<8x32xf32>
    %90 = arith.addf %87, %89 : vector<8x32xf32>
    %91 = arith.addf %90, %65 : vector<8x32xf32>
    %c0_51 = arith.constant 0 : index
    %c0_52 = arith.constant 0 : index
    %92 = vector.load %arg15[%c0_51, %c0_52] : memref<1x32xf32, #tpu.memory_space<vmem>>, vector<1x32xf32>
    %c0_53 = arith.constant 0 : index
    %c0_54 = arith.constant 0 : index
    %93 = vector.load %arg16[%c0_53, %c0_54] : memref<1x32xf32, #tpu.memory_space<vmem>>, vector<1x32xf32>
    %cst_55 = arith.constant dense<0.000000e+00> : vector<8xf32>
    %94 = vector.multi_reduction <add>, %91, %cst_55 [1] : vector<8x32xf32> to vector<8xf32>
    %95 = vector.shape_cast %94 : vector<8xf32> to vector<8x1xf32>
    %cst_56 = arith.constant 3.200000e+01 : f32
    %96 = vector.broadcast %cst_56 : f32 to vector<8x1xf32>
    %97 = arith.divf %95, %96 : vector<8x1xf32>
    %98 = vector.broadcast %97 : vector<8x1xf32> to vector<8x32xf32>
    %99 = arith.subf %91, %98 : vector<8x32xf32>
    %100 = arith.mulf %99, %99 : vector<8x32xf32>
    %cst_57 = arith.constant dense<0.000000e+00> : vector<8xf32>
    %101 = vector.multi_reduction <add>, %100, %cst_57 [1] : vector<8x32xf32> to vector<8xf32>
    %102 = vector.shape_cast %101 : vector<8xf32> to vector<8x1xf32>
    %cst_58 = arith.constant 3.200000e+01 : f32
    %103 = vector.broadcast %cst_58 : f32 to vector<8x1xf32>
    %104 = arith.divf %102, %103 : vector<8x1xf32>
    %cst_59 = arith.constant 9.99999996E-13 : f32
    %105 = vector.broadcast %cst_59 : f32 to vector<8x1xf32>
    %106 = arith.addf %104, %105 : vector<8x1xf32>
    %107 = math.rsqrt %106 : vector<8x1xf32>
    %108 = vector.broadcast %107 : vector<8x1xf32> to vector<8x32xf32>
    %109 = arith.mulf %99, %108 : vector<8x32xf32>
    %110 = vector.broadcast %92 : vector<1x32xf32> to vector<8x32xf32>
    %111 = arith.mulf %109, %110 : vector<8x32xf32>
    %112 = vector.broadcast %93 : vector<1x32xf32> to vector<8x32xf32>
    %113 = arith.addf %111, %112 : vector<8x32xf32>
    %114 = arith.truncf %113 : vector<8x32xf32> to vector<8x32xbf16>
    %c0_60 = arith.constant 0 : index
    %c0_61 = arith.constant 0 : index
    %115 = vector.load %arg17[%c0_60, %c0_61] : memref<8x32xbf16, #tpu.memory_space<vmem>>, vector<8x32xbf16>
    tpu.vector_store %arg17[%c0_60, %c0_61], %114 {strides = array<i32>} : memref<8x32xbf16, #tpu.memory_space<vmem>>, vector<8x32xbf16>,
    return
  }
  func.func @transform_0(%arg0: i32, %arg1: i32) -> (i32, i32) {
    %c1_i32 = arith.constant 1 : i32
    %0 = arith.muli %arg0, %c1_i32 : i32
    %1 = arith.addi %0, %arg1 : i32
    %c0_i32 = arith.constant 0 : i32
    %c0_i32_0 = arith.constant 0 : i32
    return %1, %c0_i32 : i32, i32
  }
  func.func @transform_1(%arg0: i32, %arg1: i32) -> (i32, i32, i32) {
    %c0_i32 = arith.constant 0 : i32
    %c0_i32_0 = arith.constant 0 : i32
    return %arg0, %arg1, %c0_i32 : i32, i32, i32
  }
  func.func @transform_2(%arg0: i32, %arg1: i32) -> (i32, i32, i32) {
    %c0_i32 = arith.constant 0 : i32
    %c0_i32_0 = arith.constant 0 : i32
    %c0_i32_1 = arith.constant 0 : i32
    return %arg0, %c0_i32, %c0_i32_0 : i32, i32, i32
  }
  func.func @transform_3(%arg0: i32, %arg1: i32) -> (i32, i32, i32) {
    %c0_i32 = arith.constant 0 : i32
    %c0_i32_0 = arith.constant 0 : i32
    %c0_i32_1 = arith.constant 0 : i32
    return %arg0, %c0_i32, %c0_i32_0 : i32, i32, i32
  }
  func.func @transform_4(%arg0: i32, %arg1: i32) -> (i32, i32, i32) {
    %c0_i32 = arith.constant 0 : i32
    %c0_i32_0 = arith.constant 0 : i32
    %c0_i32_1 = arith.constant 0 : i32
    return %arg0, %c0_i32, %c0_i32_0 : i32, i32, i32
  }
  func.func @transform_5(%arg0: i32, %arg1: i32) -> (i32, i32) {
    %c0_i32 = arith.constant 0 : i32
    %c0_i32_0 = arith.constant 0 : i32
    %c0_i32_1 = arith.constant 0 : i32
    return %c0_i32, %c0_i32_0 : i32, i32
  }
  func.func @transform_6(%arg0: i32, %arg1: i32) -> (i32, i32) {
    %c0_i32 = arith.constant 0 : i32
    %c0_i32_0 = arith.constant 0 : i32
    %c0_i32_1 = arith.constant 0 : i32
    return %c0_i32, %c0_i32_0 : i32, i32
  }
  func.func @transform_7(%arg0: i32, %arg1: i32) -> (i32, i32) {
    %c0_i32 = arith.constant 0 : i32
    %c0_i32_0 = arith.constant 0 : i32
    %c0_i32_1 = arith.constant 0 : i32
    return %c0_i32, %c0_i32_0 : i32, i32
  }
  func.func @transform_8(%arg0: i32, %arg1: i32) -> (i32, i32) {
    %c0_i32 = arith.constant 0 : i32
    %c0_i32_0 = arith.constant 0 : i32
    %c0_i32_1 = arith.constant 0 : i32
    return %c0_i32, %c0_i32_0 : i32, i32
  }
  func.func @transform_9(%arg0: i32, %arg1: i32) -> (i32, i32) {
    %c0_i32 = arith.constant 0 : i32
    %c0_i32_0 = arith.constant 0 : i32
    %c0_i32_1 = arith.constant 0 : i32
    return %c0_i32, %c0_i32_0 : i32, i32
  }
  func.func @transform_10(%arg0: i32, %arg1: i32) -> (i32, i32) {
    %c0_i32 = arith.constant 0 : i32
    %c0_i32_0 = arith.constant 0 : i32
    %c0_i32_1 = arith.constant 0 : i32
    return %c0_i32, %c0_i32_0 : i32, i32
  }
  func.func @transform_11(%arg0: i32, %arg1: i32) -> (i32, i32) {
    %c0_i32 = arith.constant 0 : i32
    %c0_i32_0 = arith.constant 0 : i32
    %c0_i32_1 = arith.constant 0 : i32
    return %c0_i32, %c0_i32_0 : i32, i32
  }
  func.func @transform_12(%arg0: i32, %arg1: i32) -> (i32, i32) {
    %c0_i32 = arith.constant 0 : i32
    %c0_i32_0 = arith.constant 0 : i32
    %c0_i32_1 = arith.constant 0 : i32
    return %c0_i32, %c0_i32_0 : i32, i32
  }
  func.func @transform_13(%arg0: i32, %arg1: i32) -> (i32, i32) {
    %c0_i32 = arith.constant 0 : i32
    %c0_i32_0 = arith.constant 0 : i32
    %c0_i32_1 = arith.constant 0 : i32
    return %c0_i32, %c0_i32_0 : i32, i32
  }
  func.func @transform_14(%arg0: i32, %arg1: i32) -> (i32, i32) {
    %c0_i32 = arith.constant 0 : i32
    %c0_i32_0 = arith.constant 0 : i32
    %c0_i32_1 = arith.constant 0 : i32
    return %c0_i32, %c0_i32_0 : i32, i32
  }
  func.func @transform_15(%arg0: i32, %arg1: i32) -> (i32, i32) {
    %c1_i32 = arith.constant 1 : i32
    %0 = arith.muli %arg0, %c1_i32 : i32
    %1 = arith.addi %0, %arg1 : i32
    %c0_i32 = arith.constant 0 : i32
    %c0_i32_0 = arith.constant 0 : i32
    return %1, %c0_i32 : i32, i32
  }
}

module attributes {stable_mosaic.version = 11 : i64} {
  func.func @_matmul_bias_kernel(%arg0: i32, %arg1: i32, %arg2: memref<16x32xbf16, #tpu.memory_space<vmem>>, %arg3: memref<32x128xbf16, #tpu.memory_space<vmem>>, %arg4: memref<1x128xf32, #tpu.memory_space<vmem>>, %arg5: memref<16x128xf32, #tpu.memory_space<vmem>>) attributes {dimension_semantics = [#tpu.dimension_semantics<parallel>, #tpu.dimension_semantics<parallel>], iteration_bounds = array<i64: 1, 1>, scalar_prefetch = 0 : i64, scratch_operands = 0 : i64, tpu.core_type = #tpu.core_type<tc>, window_params = [{transform_indices = @transform_0, window_bounds = array<i64: 16, 32>}, {transform_indices = @transform_1, window_bounds = array<i64: 32, 128>}, {transform_indices = @transform_2, window_bounds = array<i64: 1, 128>}, {transform_indices = @transform_3, window_bounds = array<i64: 16, 128>}]} {
    %c0 = arith.constant 0 : index
    %c0_0 = arith.constant 0 : index
    %0 = vector.load %arg2[%c0, %c0_0] : memref<16x32xbf16, #tpu.memory_space<vmem>>, vector<16x32xbf16>
    %c0_1 = arith.constant 0 : index
    %c0_2 = arith.constant 0 : index
    %1 = vector.load %arg3[%c0_1, %c0_2] : memref<32x128xbf16, #tpu.memory_space<vmem>>, vector<32x128xbf16>
    %cst = arith.constant dense<0.000000e+00> : vector<16x128xf32>
    %2 = tpu.matmul %0, %1, %cst {dimension_numbers = #tpu.dot_dimension_numbers<[1], [0], [0], [1], [0, 0, 1, 1], [], []>} : vector<16x32xbf16>, vector<32x128xbf16>, vector<16x128xf32> -> vector<16x128xf32>
    %c0_3 = arith.constant 0 : index
    %c0_4 = arith.constant 0 : index
    %3 = vector.load %arg4[%c0_3, %c0_4] : memref<1x128xf32, #tpu.memory_space<vmem>>, vector<1x128xf32>
    %4 = vector.broadcast %3 : vector<1x128xf32> to vector<16x128xf32>
    %5 = arith.addf %2, %4 : vector<16x128xf32>
    %c0_5 = arith.constant 0 : index
    %c0_6 = arith.constant 0 : index
    %6 = vector.load %arg5[%c0_5, %c0_6] : memref<16x128xf32, #tpu.memory_space<vmem>>, vector<16x128xf32>
    tpu.vector_store %arg5[%c0_5, %c0_6], %5 {strides = array<i32>} : memref<16x128xf32, #tpu.memory_space<vmem>>, vector<16x128xf32>,
    return
  }
  func.func @transform_0(%arg0: i32, %arg1: i32) -> (i32, i32) {
    %c0_i32 = arith.constant 0 : i32
    %c0_i32_0 = arith.constant 0 : i32
    return %arg0, %c0_i32 : i32, i32
  }
  func.func @transform_1(%arg0: i32, %arg1: i32) -> (i32, i32) {
    %c0_i32 = arith.constant 0 : i32
    %c0_i32_0 = arith.constant 0 : i32
    return %c0_i32, %arg1 : i32, i32
  }
  func.func @transform_2(%arg0: i32, %arg1: i32) -> (i32, i32) {
    %c0_i32 = arith.constant 0 : i32
    %c0_i32_0 = arith.constant 0 : i32
    return %c0_i32, %arg1 : i32, i32
  }
  func.func @transform_3(%arg0: i32, %arg1: i32) -> (i32, i32) {
    %c0_i32 = arith.constant 0 : i32
    return %arg0, %arg1 : i32, i32
  }
}

</mosaic_0001>

<bundles_post_ra>
// kernel: _lambda_.28
= control target key start
LH: loop header
LB: loop body
LE: loop exit
PB: predicated region body
PF: predicated region fallthrough
CT: control target
= control target key end

     0   :  { %vm48_vm0 = vcmask 261120   ;;  %v186_v28 = vmov 32.0   ;;  %vm149_vm6 = vcmask 257024   ;;  %s246_s1 = inlined_call_operand.vmem [shape: bf16[32,32], index: 1, kind: input, shape index: {}]   ;;  %s247_s2 = inlined_call_operand.vmem [shape: f32[1,32], index: 2, kind: input, shape index: {}, may-alias: {2,4}]   ;;  %s248_s0 = inlined_call_operand.vmem [shape: bf16[16,32], index: 0, kind: input, shape index: {}]   ;;  %s249_s3 = inlined_call_operand.vmem [shape: f32[1,32], index: 3, kind: input, shape index: {}]   ;;  %s250_s4 = inlined_call_operand.vmem [shape: f32[1,32], index: 4, kind: input, shape index: {}, may-alias: {2,4}]   ;;  %s251_s5 = inlined_call_operand.vmem [shape: bf16[16,32], index: 5, kind: output, shape index: {}]  }
   0x1   :  { %v171_v0 = vld [vmem:[%s246_s1 + $0x8] sm:$0xff]  ;;  %v170_v1 = vld [vmem:[%s246_s1] sm:$0xff] }
   0x2   :  { %58 = vmatpush.bf16.msra.mxu0 %v171_v0  ;;  %v169_v2 = vld [vmem:[%s248_s0] sm:$0xff] }
   0x3   :  { %v173_v3 = vld [vmem:[%s247_s2] ss:$0 sm:$0xff] }
   0x4   :  { %v174_v59 = vld [vmem:[%s249_s3] ss:$0 sm:$0xff] }
   0x5   :  { %v175_v62 = vld [vmem:[%s250_s4] ss:$0 sm:$0xff] }
   0x6   :  { %59 = vmatpush.bf16.msra.mxu0 %v170_v1 }
   0x9   :  { %168 = vmatmul.msk.bf16.vlgmr.msra.gmra.mxu0 %vm48_vm0, %v169_v2 }
  0x86   :  { %v61_v4 = vpop.f32.mrf.mxu0 }
  0x87   :  { %v62_v5 = vadd.f32 %v173_v3, %v61_v4 }
  0x89   :  { %v68_v6 = vmul.f32 %v62_v5, %v62_v5  ;;  %v66_v19 = vmul.f32 0.5, %v62_v5 }
  0x8b   :  { %v70_v7 = vmul.f32 %v68_v6, %v62_v5 }
  0x8d   :  { %v72_v8 = vmul.f32 0.044715, %v70_v7 }
  0x8e   :  { %v63_v9 = vpop.f32.mrf.mxu0 }
  0x8f   :  { %v64_v10 = vadd.f32 %v173_v3, %v63_v9  ;;  %v74_v11 = vadd.f32 %v72_v8, %v62_v5 }
  0x91   :  { %v69_v12 = vmul.f32 %v64_v10, %v64_v10  ;;  %v76_v13 = vmul.f32 0.7978846, %v74_v11  ;;  %v67_v24 = vmul.f32 0.5, %v64_v10 }
  0x93   :  { %v71_v14 = vmul.f32 %v69_v12, %v64_v10  ;;  %176 = vtanh.f32 %v76_v13 }
  0x95   :  { %v73_v15 = vmul.f32 0.044715, %v71_v14 }
  0x97   :  { %v75_v16 = vadd.f32 %v73_v15, %v64_v10 }
  0x99   :  { %v177_v17 = vpop.eup %176  ;;  %v77_v18 = vmul.f32 0.7978846, %v75_v16 }
  0x9a   :  { %v80_v20 = vadd.f32 1.0, %v177_v17 }
  0x9b   :  { %178 = vtanh.f32 %v77_v18 }
  0x9c   :  { %v82_v21 = vmul.f32 %v80_v20, %v66_v19  ;;  %180 = vrcp.f32 %v186_v28 }
  0x9e   :  { %v86_v22 = vsel %vm48_vm0, %v82_v21, 0.0 }
  0x9f   :  { %87 = vadd.xlane.f32.xlu0 %v86_v22 }
  0xa1   :  { %v179_v23 = vpop.eup %178 }
  0xa2   :  { %v81_v25 = vadd.f32 1.0, %v179_v23  ;;  %v181_v29 = vpop.eup %180 }
  0xa3   :  { %v93_v30 = vmul.f32 32.0, %v181_v29  ;;  %vm97_vm1 = vweird.f32 %v181_v29 }
  0xa4   :  { %v83_v26 = vmul.f32 %v81_v25, %v67_v24 }
  0xa5   :  { %v94_v31 = vsub.f32 1.0, %v93_v30 }
  0xa6   :  { %v89_v27 = vsel %vm48_vm0, %v83_v26, 0.0 }
  0xa7   :  { %90 = vadd.xlane.f32.xlu0 %v89_v27  ;;  %v95_v32 = vmul.f32 %v181_v29, %v94_v31 }
  0xa9   :  { %v96_v33 = vadd.f32 %v181_v29, %v95_v32 }
  0xab   :  { %v98_v34 = vsel %vm97_vm1, %v181_v29, %v96_v33 }
 0x112   :  { %v88_v35 = vpop.xlane.xlu0 %87 }
 0x113   :  { %v99_v36 = vmul.f32 %v98_v34, %v88_v35 }
 0x115   :  { %v101_v37 = vsub.f32 %v82_v21, %v99_v36 }
 0x117   :  { %v103_v38 = vmul.f32 %v101_v37, %v101_v37 }
 0x119   :  { %v105_v39 = vsel %vm48_vm0, %v103_v38, 0.0 }
 0x11a   :  { %106 = vadd.xlane.f32.xlu1 %v105_v39  ;;  %v91_v40 = vpop.xlane.xlu0 %90 }
 0x11b   :  { %v100_v41 = vmul.f32 %v98_v34, %v91_v40 }
 0x11d   :  { %v102_v42 = vsub.f32 %v83_v26, %v100_v41 }
 0x11f   :  { %v104_v43 = vmul.f32 %v102_v42, %v102_v42 }
 0x121   :  { %v108_v44 = vsel %vm48_vm0, %v104_v43, 0.0 }
 0x122   :  { %109 = vadd.xlane.f32.xlu1 %v108_v44 }
 0x18d   :  { %v107_v45 = vpop.xlane.xlu1 %106 }
 0x18e   :  { %v111_v46 = vmul.f32 %v107_v45, %v98_v34 }
 0x190   :  { %v113_v47 = vadd.f32 1e-12, %v111_v46 }
 0x192   :  { %182 = vrsqrt.f32 %v113_v47  ;;  %vm121_vm3 = vweird.f32 %v113_v47 }
 0x195   :  { %v110_v48 = vpop.xlane.xlu1 %109 }
 0x196   :  { %v112_v49 = vmul.f32 %v110_v48, %v98_v34 }
 0x198   :  { %v183_v50 = vpop.eup %182  ;;  %v114_v51 = vadd.f32 1e-12, %v112_v49 }
 0x199   :  { %v116_v52 = vmul.f32 %v183_v50, %v113_v47  ;;  %vm122_vm2 = vweird.f32 %v183_v50 }
 0x19a   :  { %184 = vrsqrt.f32 %v114_v51  ;;  %vm123_vm4 = vmor %vm121_vm3, %vm122_vm2  ;;  %vm131_vm7 = vweird.f32 %v114_v51 }
 0x19b   :  { %v117_v53 = vmul.f32 %v183_v50, %v116_v52 }
 0x19d   :  { %v118_v54 = vmul.f32 0.5, %v117_v53 }
 0x19f   :  { %v119_v55 = vsub.f32 1.5, %v118_v54 }
 0x1a0   :  { %v185_v56 = vpop.eup %184 }
 0x1a1   :  { %v120_v57 = vmul.f32 %v183_v50, %v119_v55  ;;  %v126_v58 = vmul.f32 %v185_v56, %v114_v51  ;;  %vm132_vm5 = vweird.f32 %v185_v56 }
 0x1a2   :  { %vm133_vm8 = vmor %vm131_vm7, %vm132_vm5 }
 0x1a3   :  { %v124_v60 = vsel %vm123_vm4, %v183_v50, %v120_v57  ;;  %v127_v61 = vmul.f32 %v185_v56, %v126_v58 }
 0x1a4   :  { %v135_v63 = vmul.f32 %v124_v60, %v101_v37 }
 0x1a5   :  { %v128_v0 = vmul.f32 0.5, %v127_v61 }
 0x1a6   :  { %v140_v1 = vmul.f32 %v174_v59, %v135_v63 }
 0x1a7   :  { %v129_v2 = vsub.f32 1.5, %v128_v0 }
 0x1a8   :  { %v145_v3 = vadd.f32 %v175_v62, %v140_v1 }
 0x1a9   :  { %v130_v4 = vmul.f32 %v185_v56, %v129_v2 }
 0x1aa   :  { %v147_v5 = vpack.c.bf16 %v145_v3, %v145_v3 }
 0x1ab   :  { %v134_v6 = vsel %vm133_vm8, %v185_v56, %v130_v4 }
 0x1ac   :  { %150 = vst.msk [vmem:[%s251_s5] sm:$0xf] %vm149_vm6, %v147_v5  ;;  %v136_v7 = vmul.f32 %v134_v6, %v102_v42 }
 0x1ae   :  { %v141_v8 = vmul.f32 %v174_v59, %v136_v7 }
 0x1b0   :  { %v146_v9 = vadd.f32 %v175_v62, %v141_v8 }
 0x1b2   :  { %v148_v10 = vpack.c.bf16 %v146_v9, %v146_v9 }
 0x1b4   :  { %151 = vst.msk [vmem:[%s251_s5 + $0x4] sm:$0xf] %vm149_vm6, %v148_v10 }

// kernel: _lambda_.15
= control target key start
LH: loop header
LB: loop body
LE: loop exit
PB: predicated region body
PF: predicated region fallthrough
CT: control target
= control target key end

     0   :  { %vm20_vm0 = vcmask 261120   ;;  %v104_v5 = vmov 32.0   ;;  %vm84_vm6 = vcmask 257024   ;;  %s144_s0 = inlined_call_operand.vmem [shape: bf16[16,32], index: 0, kind: input, shape index: {}]   ;;  %s145_s1 = inlined_call_operand.vmem [shape: f32[1,32], index: 1, kind: input, shape index: {}]   ;;  %s146_s2 = inlined_call_operand.vmem [shape: f32[1,32], index: 2, kind: input, shape index: {}]   ;;  %s147_s3 = inlined_call_operand.vmem [shape: bf16[16,32], index: 3, kind: output, shape index: {}]  }
   0x1   :  { %v92_v0 = vld [vmem:[%s144_s0] sm:$0xff]   ;;  %98 = vrcp.f32 %v104_v5 }
   0x2   :  { %v93_v1 = vunpack.c.l.bf16 %v92_v0  ;;  %v94_v3 = vunpack.c.h.bf16 %v92_v0  ;;  %v96_v36 = vld [vmem:[%s145_s1] ss:$0 sm:$0xff] }
   0x3   :  { %v97_v39 = vld [vmem:[%s146_s2] ss:$0 sm:$0xff] }
   0x4   :  { %v21_v2 = vsel %vm20_vm0, %v93_v1, 0.0  ;;  %v24_v4 = vsel %vm20_vm0, %v94_v3, 0.0 }
   0x5   :  { %22 = vadd.xlane.f32.xlu0 %v21_v2 }
   0x7   :  { %v99_v6 = vpop.eup %98 }
   0x8   :  { %v28_v7 = vmul.f32 32.0, %v99_v6  ;;  %vm32_vm1 = vweird.f32 %v99_v6 }
   0xa   :  { %v29_v8 = vsub.f32 1.0, %v28_v7 }
   0xc   :  { %v30_v9 = vmul.f32 %v99_v6, %v29_v8 }
   0xd   :  { %25 = vadd.xlane.f32.xlu0 %v24_v4 }
   0xe   :  { %v31_v10 = vadd.f32 %v99_v6, %v30_v9 }
  0x10   :  { %v33_v11 = vsel %vm32_vm1, %v99_v6, %v31_v10 }
  0x78   :  { %v23_v12 = vpop.xlane.xlu0 %22 }
  0x79   :  { %v34_v13 = vmul.f32 %v33_v11, %v23_v12 }
  0x7b   :  { %v36_v14 = vsub.f32 %v93_v1, %v34_v13 }
  0x7d   :  { %v38_v15 = vmul.f32 %v36_v14, %v36_v14 }
  0x7f   :  { %v40_v16 = vsel %vm20_vm0, %v38_v15, 0.0 }
  0x80   :  { %41 = vadd.xlane.f32.xlu1 %v40_v16  ;;  %v26_v17 = vpop.xlane.xlu0 %25 }
  0x81   :  { %v35_v18 = vmul.f32 %v33_v11, %v26_v17 }
  0x83   :  { %v37_v19 = vsub.f32 %v94_v3, %v35_v18 }
  0x85   :  { %v39_v20 = vmul.f32 %v37_v19, %v37_v19 }
  0x87   :  { %v43_v21 = vsel %vm20_vm0, %v39_v20, 0.0 }
  0x88   :  { %44 = vadd.xlane.f32.xlu1 %v43_v21 }
  0xf3   :  { %v42_v22 = vpop.xlane.xlu1 %41 }
  0xf4   :  { %v46_v23 = vmul.f32 %v42_v22, %v33_v11 }
  0xf6   :  { %v48_v24 = vadd.f32 1e-12, %v46_v23 }
  0xf8   :  { %100 = vrsqrt.f32 %v48_v24  ;;  %vm56_vm3 = vweird.f32 %v48_v24 }
  0xfb   :  { %v45_v25 = vpop.xlane.xlu1 %44 }
  0xfc   :  { %v47_v26 = vmul.f32 %v45_v25, %v33_v11 }
  0xfe   :  { %v101_v27 = vpop.eup %100  ;;  %v49_v28 = vadd.f32 1e-12, %v47_v26 }
  0xff   :  { %v51_v29 = vmul.f32 %v101_v27, %v48_v24  ;;  %vm57_vm2 = vweird.f32 %v101_v27 }
 0x100   :  { %102 = vrsqrt.f32 %v49_v28  ;;  %vm58_vm4 = vmor %vm56_vm3, %vm57_vm2  ;;  %vm66_vm7 = vweird.f32 %v49_v28 }
 0x101   :  { %v52_v30 = vmul.f32 %v101_v27, %v51_v29 }
 0x103   :  { %v53_v31 = vmul.f32 0.5, %v52_v30 }
 0x105   :  { %v54_v32 = vsub.f32 1.5, %v53_v31 }
 0x106   :  { %v103_v33 = vpop.eup %102 }
 0x107   :  { %v55_v34 = vmul.f32 %v101_v27, %v54_v32  ;;  %v61_v35 = vmul.f32 %v103_v33, %v49_v28  ;;  %vm67_vm5 = vweird.f32 %v103_v33 }
 0x108   :  { %vm68_vm8 = vmor %vm66_vm7, %vm67_vm5 }
 0x109   :  { %v59_v37 = vsel %vm58_vm4, %v101_v27, %v55_v34  ;;  %v62_v38 = vmul.f32 %v103_v33, %v61_v35 }
 0x10a   :  { %v70_v40 = vmul.f32 %v59_v37, %v36_v14 }
 0x10b   :  { %v63_v41 = vmul.f32 0.5, %v62_v38 }
 0x10c   :  { %v75_v42 = vmul.f32 %v96_v36, %v70_v40 }
 0x10d   :  { %v64_v43 = vsub.f32 1.5, %v63_v41 }
 0x10e   :  { %v80_v44 = vadd.f32 %v97_v39, %v75_v42 }
 0x10f   :  { %v65_v45 = vmul.f32 %v103_v33, %v64_v43 }
 0x110   :  { %v82_v46 = vpack.c.bf16 %v80_v44, %v80_v44 }
 0x111   :  { %v69_v47 = vsel %vm68_vm8, %v103_v33, %v65_v45 }
 0x112   :  { %85 = vst.msk [vmem:[%s147_s3] sm:$0xf] %vm84_vm6, %v82_v46  ;;  %v71_v48 = vmul.f32 %v69_v47, %v37_v19 }
 0x114   :  { %v76_v49 = vmul.f32 %v96_v36, %v71_v48 }
 0x116   :  { %v81_v50 = vadd.f32 %v97_v39, %v76_v49 }
 0x118   :  { %v83_v51 = vpack.c.bf16 %v81_v50, %v81_v50 }
 0x11a   :  { %86 = vst.msk [vmem:[%s147_s3 + $0x4] sm:$0xf] %vm84_vm6, %v83_v51 }

// kernel: _lambda_.16
= control target key start
LH: loop header
LB: loop body
LE: loop exit
PB: predicated region body
PF: predicated region fallthrough
CT: control target
= control target key end

     0   :  { %vm42_vm0 = vcmask 261120   ;;  %vm62_vm1 = vcmask 781312   ;;  %s124_s1 = inlined_call_operand.vmem [shape: bf16[32,96], index: 1, kind: input, shape index: {}]   ;;  %s125_s2 = inlined_call_operand.vmem [shape: f32[1,96], index: 2, kind: input, shape index: {}]   ;;  %s126_s0 = inlined_call_operand.vmem [shape: bf16[16,32], index: 0, kind: input, shape index: {}]   ;;  %s127_s3 = inlined_call_operand.vmem [shape: bf16[16,96], index: 3, kind: output, shape index: {}]  }
   0x1   :  { %v84_v0 = vld [vmem:[%s124_s1 + $0x8] sm:$0xff]  ;;  %v83_v1 = vld [vmem:[%s124_s1] sm:$0xff] }
   0x2   :  { %52 = vmatpush.bf16.msra.mxu0 %v84_v0  ;;  %v82_v2 = vld [vmem:[%s126_s0] sm:$0xff] }
   0x3   :  { %v85_v3 = vld [vmem:[%s125_s2] ss:$0 sm:$0xff] }
   0x6   :  { %53 = vmatpush.bf16.msra.mxu0 %v83_v1 }
   0x9   :  { %81 = vmatmul.msk.bf16.vlgmr.msra.gmra.mxu0 %vm42_vm0, %v82_v2 }
  0x86   :  { %v55_v4 = vpop.f32.mrf.mxu0 }
  0x87   :  { %v56_v5 = vadd.f32 %v85_v3, %v55_v4 }
  0x89   :  { %v60_v6 = vpack.c.bf16 %v56_v5, %v56_v5 }
  0x8b   :  { %63 = vst.msk [vmem:[%s127_s3] sm:$0xf] %vm62_vm1, %v60_v6 }
  0x8e   :  { %v57_v7 = vpop.f32.mrf.mxu0 }
  0x8f   :  { %v58_v8 = vadd.f32 %v85_v3, %v57_v7 }
  0x91   :  { %v61_v9 = vpack.c.bf16 %v58_v8, %v58_v8 }
  0x93   :  { %64 = vst.msk [vmem:[%s127_s3 + $0x4] sm:$0xf] %vm62_vm1, %v61_v9 }

// kernel: _lambda_.17
= control target key start
LH: loop header
LB: loop body
LE: loop exit
PB: predicated region body
PF: predicated region fallthrough
CT: control target
= control target key end

     0   :  { %s1411_s18 = smov 0   ;;  %s1413_s19 = smov 0   ;;  %s1546_s0 = inlined_call_operand.vmem [shape: bf16[16,32], index: 0, kind: input, shape index: {}]   ;;  %s1547_s1 = inlined_call_operand.vmem [shape: bf16[8,8,8], index: 1, kind: input, shape index: {}]   ;;  %s1548_s2 = inlined_call_operand.vmem [shape: bf16[8,8,8], index: 2, kind: input, shape index: {}]   ;;  %s1549_s3 = inlined_call_operand.vmem [shape: bf16[8,8,8], index: 3, kind: input, shape index: {}]   ;;  %s1550_s4 = inlined_call_operand.vmem [shape: f32[2,1,8], index: 4, kind: input, shape index: {}]   ;;  %s1551_s5 = inlined_call_operand.vmem [shape: bf16[32,32], index: 5, kind: input, shape index: {}]   ;;  %s1552_s6 = inlined_call_operand.vmem [shape: f32[1,32], index: 6, kind: input, shape index: {}, may-alias: {6,8,12,14}]   ;;  %s1553_s7 = inlined_call_operand.vmem [shape: f32[1,32], index: 7, kind: input, shape index: {}, may-alias: {7,13}]   ;;  %s1554_s8 = inlined_call_operand.vmem [shape: f32[1,32], index: 8, kind: input, shape index: {}, may-alias: {6,8,12,14}]   ;;  %s1555_s9 = inlined_call_operand.vmem [shape: bf16[32,64], index: 9, kind: input, shape index: {}]   ;;  %s1556_s10 = inlined_call_operand.vmem [shape: f32[1,64], index: 10, kind: input, shape index: {}]   ;;  %s1557_s11 = inlined_call_operand.vmem [shape: bf16[64,32], index: 11, kind: input, shape index: {}]   ;;  %s1558_s12 = inlined_call_operand.vmem [shape: f32[1,32], index: 12, kind: input, shape index: {}, may-alias: {6,8,12,14}]   ;;  %s1559_s13 = inlined_call_operand.vmem [shape: f32[1,32], index: 13, kind: input, shape index: {}, may-alias: {7,13}]   ;;  %s1560_s14 = inlined_call_operand.vmem [shape: f32[1,32], index: 14, kind: input, shape index: {}, may-alias: {6,8,12,14}]   ;;  %s1561_s15 = inlined_call_operand.vmem [shape: bf16[16,32], index: 15, kind: output, shape index: {}]  }
   0x1   :  { %s1415_s20 = smov 0  }
   0x2 LB: > { %s37_s21 = sadd.s32 1, %s1321_s19  ;;  %p1181_p0 = scmp.ge.s32.totalorder %s1325_s20, 1  ;;  %s1325_s20 = sphi %s1415_s20, %s25_s20   ;;  %s1321_s19 = sphi %s1413_s19, %s1563_s19   ;;  %s1317_s18 = sphi %s1411_s18, %s1562_s18  }
   0x3   : > { %p39_p1 = scmp.ge.s32.totalorder %s37_s21, 2  ;;  %p500_p2 = scmp.lt.s32.totalorder %s1325_s20, 3 }
   0x5   : > { %s1565_s21 = smov (%p39_p1, %s37_s21), 0  ;;  %p501_p3 = pnand %p1181_p0, %p500_p2 }
   0x6   : > { %s1183_s22 = sshll.u32 (!%p501_p3), %s1317_s18, 2  ;;  %p570_p4 = scmp.lt.s32.totalorder (!%p501_p3), %s1317_s18, 1 }
   0x7   : > { %504 = sbr.rel (%p501_p3) target bundleno = 1637 (0x665), region = 80  ;;  %p576_p5 = scmp.lt.s32.totalorder (!%p501_p3), %s1183_s22, 7 }
   0x8   : > { %s1329_s27 = smov (!%p501_p3), 24  }
   0xc   : > { %s1567_s18 = smov (!%p570_p4, %s1317_s18), 1  ;;  %s1569_s22 = smov (!%p576_p5, %s1183_s22), 7  ;;  %vm622_vm0 = vcmask 64512   ;;  %vm750_vm1 = vcmask 1043456   ;;  %vm825_vm2 = vcmask 60416   ;;  %vm832_vm3 = vcmask 126016  }
   0xd   : > { %s598_s25 = scalar_lea.vmem %s1550_s4, %s1567_s18  ;;  %s1435_s26 = sshll.u32 %s1569_s22, 2  ;;  %vm839_vm4 = vcmask 191616   ;;  %vm846_vm5 = vcmask 257216   ;;  %vm871_vm6 = vcmask 261120   ;;  %vm1011_vm11 = vcmask 523264  }
   0xe   : > { %s588_s29 = scalar_lea.vmem %s1548_s2, %s1435_s26  ;;  %s582_s17 = scalar_lea.vmem %s1547_s1, %s1435_s26  ;;  %v1271_v12 = vld [vmem:[%s598_s25] ss:$0 sm:$0xff]  ;;  %vm1062_vm15 = vcmask 257024  }
   0xf   : > { %v611_v0 = vld [vmem:[%s588_s29 + $0x4] sm:$0xf]  ;;  %v612_v1 = vld [vmem:[%s588_s29 + $0x8] sm:$0xf]  ;;  %v613_v2 = vld [vmem:[%s588_s29 + $0xc] sm:$0xf]  ;;  %s594_s24 = scalar_lea.vmem %s1549_s3, %s1435_s26 }
  0x10   : > { %v646_v3 = vsel %vm622_vm0, %v611_v0, 0  ;;  %v665_v4 = vsel %vm622_vm0, %v612_v1, 0  ;;  %v684_v5 = vsel %vm622_vm0, %v613_v2, 0  ;;  %v610_v6 = vld [vmem:[%s588_s29] sm:$0xf]  ;;  %s1327_s25 = smov 8  }
  0x11   : > { %655 = vmatpush.bf16.xpose.msra.mxu1 %v646_v3  ;;  %674 = vmatpush.bf16.xpose.msra.mxu2 %v665_v4  ;;  %v627_v7 = vsel %vm622_vm0, %v610_v6, 0  ;;  %v607_v8 = vld [vmem:[%s582_s17 + $0x4] sm:$0xf]  ;;  %v608_v9 = vld [vmem:[%s582_s17 + $0x8] sm:$0xf]  ;;  %s1328_s26 = smov 16  }
  0x12   : > { %693 = vmatpush.bf16.xpose.msra.mxu3 %v684_v5  ;;  %636 = vmatpush.bf16.xpose.msra.mxu0 %v627_v7  ;;  %v609_v10 = vld [vmem:[%s582_s17 + $0xc] sm:$0xf]  ;;  %v606_v11 = vld [vmem:[%s582_s17] sm:$0xf]  ;;  %v615_v49 = vld [vmem:[%s594_s24 + $0x4] sm:$0xf] }
  0x13   : > { %v771_v50 = vsel %vm750_vm1, %v615_v49, 0  ;;  %v616_v51 = vld [vmem:[%s594_s24 + $0x8] sm:$0xf]  ;;  %v617_v53 = vld [vmem:[%s594_s24 + $0xc] sm:$0xf]  ;;  %s1182_s17 = sshll.u32 %s1567_s18, 2 }
  0x14   : > { %v790_v52 = vsel %vm750_vm1, %v616_v51, 0  ;;  %v614_v54 = vld [vmem:[%s594_s24] sm:$0xf]  ;;  %v809_v55 = vsel %vm750_vm1, %v617_v53, 0  ;;  %s573_s24 = scalar_lea.vmem %s1546_s0, %s1182_s17  ;;  %s603_s23 = scalar_lea.vmem %s1561_s15, %s1182_s17 }
  0x15   : > { %v752_v56 = vsel %vm750_vm1, %v614_v54, 0 }
  0x18   : > { %1191 = vmatmul.msk.bf16.vlgmr.msra.gmra.mxu1 %vm622_vm0, %v607_v8  ;;  %1192 = vmatmul.msk.bf16.vlgmr.msra.gmra.mxu2 %vm622_vm0, %v608_v9 }
  0x19   : > { %1193 = vmatmul.msk.bf16.vlgmr.msra.gmra.mxu3 %vm622_vm0, %v609_v10  ;;  %1190 = vmatmul.msk.bf16.vlgmr.msra.gmra.mxu0 %vm622_vm0, %v606_v11 }
  0x1a   : > { %780 = vmatpush.bf16.msrb.mxu1 %v771_v50  ;;  %799 = vmatpush.bf16.msrb.mxu2 %v790_v52 }
  0x1b   : > { %818 = vmatpush.bf16.msrb.mxu3 %v809_v55  ;;  %761 = vmatpush.bf16.msrb.mxu0 %v752_v56 }
  0x95   : > { %v657_v13 = vpop.f32.mrf.mxu1 }
  0x96   : > { %v658_v14 = vadd.f32 %v1271_v12, %v657_v13  ;;  %v638_v15 = vpop.f32.mrf.mxu0 }
  0x97   : > { %v639_v17 = vadd.f32 %v1271_v12, %v638_v15 }
  0x98   : > { %v702_v16 = vsel %vm622_vm0, %v658_v14, -inf }
  0x99   : > { %703 = vmax.xlane.f32.xlu1 %v702_v16  ;;  %v699_v23 = vsel %vm622_vm0, %v639_v17, -inf }
  0x9b   : > { %v676_v18 = vpop.f32.mrf.mxu2 }
  0x9c   : > { %v677_v19 = vadd.f32 %v1271_v12, %v676_v18  ;;  %v695_v20 = vpop.f32.mrf.mxu3 }
  0x9d   : > { %v659_v21 = vpop.f32.mrf.mxu1  ;;  %v696_v25 = vadd.f32 %v1271_v12, %v695_v20 }
  0x9e   : > { %v705_v22 = vsel %vm622_vm0, %v677_v19, -inf  ;;  %v640_v24 = vpop.f32.mrf.mxu0 }
  0x9f   : > { %706 = vmax.xlane.f32.xlu0 %v705_v22  ;;  %v708_v28 = vsel %vm622_vm0, %v696_v25, -inf  ;;  %v1236_v22 = vld [vmem:[%s1551_s5 + $0x8] sm:$0xff] }
  0xa0   : > { %881 = vmatpush.bf16.msra.mxu0 %v1236_v22 }
  0xa1   : > { %700 = vmax.xlane.f32.xlu1 %v699_v23  ;;  %v1235_v23 = vld [vmem:[%s1551_s5] sm:$0xff] }
  0xa3   : > { %v678_v26 = vpop.f32.mrf.mxu2 }
  0xa4   : > { %v697_v27 = vpop.f32.mrf.mxu3  ;;  %882 = vmatpush.bf16.msra.mxu0 %v1235_v23 }
  0xa5   : > { %v848_v27 = vld [vmem:[%s573_s24] sm:$0xf] }
  0xa7   : > { %709 = vmax.xlane.f32.xlu0 %v708_v28  ;;  %v1272_v28 = vld [vmem:[%s1552_s6] ss:$0 sm:$0xff] }
 0x10c   : > { %v704_v29 = vpop.xlane.xlu1 %703 }
 0x10d   : > { %v712_v30 = vsub.f32 %v658_v14, %v704_v29  ;;  %v849_v29 = vunpack.c.l.bf16 %v848_v27 }
 0x10f   : > { %v717_v31 = vmul.f32 1.442695, %v712_v30 }
 0x111   : > { %1279 = vpow2.f32 %v717_v31 }
 0x112   : > { %v707_v32 = vpop.xlane.xlu0 %706 }
 0x113   : > { %v713_v33 = vsub.f32 %v677_v19, %v707_v32 }
 0x114   : > { %v701_v34 = vpop.xlane.xlu1 %700 }
 0x115   : > { %v719_v35 = vmul.f32 1.442695, %v713_v33  ;;  %v711_v36 = vsub.f32 %v639_v17, %v701_v34 }
 0x117   : > { %v1280_v37 = vpop.eup %1279  ;;  %1281 = vpow2.f32 %v719_v35  ;;  %v715_v38 = vmul.f32 1.442695, %v711_v36  ;;  %v1330_v35 = vmov 32.0  }
 0x118   : > { %v726_v39 = vsel %vm622_vm0, %v1280_v37, 0.0 }
 0x119   : > { %1283 = vpow2.f32 %v715_v38  ;;  %727 = vadd.xlane.f32.xlu0 %v726_v39 }
 0x11a   : > { %v710_v40 = vpop.xlane.xlu0 %709 }
 0x11b   : > { %v714_v41 = vsub.f32 %v696_v25, %v710_v40 }
 0x11d   : > { %v1282_v42 = vpop.eup %1281  ;;  %v721_v43 = vmul.f32 1.442695, %v714_v41 }
 0x11e   : > { %v729_v44 = vsel %vm622_vm0, %v1282_v42, 0.0 }
 0x11f   : > { %v1284_v45 = vpop.eup %1283  ;;  %1285 = vpow2.f32 %v721_v43  ;;  %730 = vadd.xlane.f32.xlu2 %v729_v44 }
 0x120   : > { %v723_v46 = vsel %vm622_vm0, %v1284_v45, 0.0 }
 0x121   : > { %724 = vadd.xlane.f32.xlu1 %v723_v46 }
 0x125   : > { %v1286_v47 = vpop.eup %1285 }
 0x126   : > { %v732_v48 = vsel %vm622_vm0, %v1286_v47, 0.0 }
 0x127   : > { %733 = vadd.xlane.f32.xlu2 %v732_v48  ;;  %v1237_v48 = vld [vmem:[%s1555_s9] sm:$0xff] }
 0x18c   : > { %v728_v57 = vpop.xlane.xlu0 %727 }
 0x18d   : > { %1287 = vrcp.f32 %v728_v57 }
 0x192   : > { %v731_v58 = vpop.xlane.xlu2 %730 }
 0x193   : > { %v1288_v59 = vpop.eup %1287  ;;  %1289 = vrcp.f32 %v731_v58  ;;  %v1273_v58 = vld [vmem:[%s1553_s7] ss:$0 sm:$0xff] }
 0x194   : > { %v740_v60 = vmul.f32 %v1288_v59, %v1280_v37  ;;  %v725_v61 = vpop.xlane.xlu1 %724 }
 0x195   : > { %1291 = vrcp.f32 %v725_v61 }
 0x196   : > { %v744_v62 = vpack.c.bf16 %v740_v60, %v740_v60  ;;  %v1274_v60 = vld [vmem:[%s1554_s8] ss:$0 sm:$0xff] }
 0x198   : > { %1195 = vmatmul.msk.bf16.vlgmr.msrb.gmra.mxu1 %vm622_vm0, %v744_v62 }
 0x199   : > { %v1290_v63 = vpop.eup %1289 }
 0x19a   : > { %v741_v0 = vmul.f32 %v1290_v63, %v1282_v42  ;;  %v734_v1 = vpop.xlane.xlu2 %733 }
 0x19b   : > { %v1292_v2 = vpop.eup %1291  ;;  %1293 = vrcp.f32 %v734_v1  ;;  %v1242_v1 = vld [vmem:[%s1557_s11 + $0x18] sm:$0xff] }
 0x19c   : > { %v739_v3 = vmul.f32 %v1292_v2, %v1284_v45  ;;  %v745_v4 = vpack.c.bf16 %v741_v0, %v741_v0  ;;  %1295 = vrcp.f32 %v1330_v35  ;;  %1019 = vmatpush.bf16.msra.mxu2 %v1242_v1  ;;  %v1241_v2 = vld [vmem:[%s1557_s11 + $0x10] sm:$0xff] }
 0x19e   : > { %1196 = vmatmul.msk.bf16.vlgmr.msrb.gmra.mxu2 %vm622_vm0, %v745_v4  ;;  %v743_v5 = vpack.c.bf16 %v739_v3, %v739_v3  ;;  %v1240_v3 = vld [vmem:[%s1557_s11 + $0x8] sm:$0xff]  ;;  %v1239_v4 = vld [vmem:[%s1557_s11] sm:$0xff] }
 0x1a0   : > { %1194 = vmatmul.msk.bf16.vlgmr.msrb.gmra.mxu0 %vm622_vm0, %v743_v5  ;;  %1020 = vmatpush.bf16.msra.mxu2 %v1241_v2  ;;  %v1275_v5 = vld [vmem:[%s1556_s10] ss:$0 sm:$0xff] }
 0x1a1   : > { %v1294_v6 = vpop.eup %1293 }
 0x1a2   : > { %v742_v7 = vmul.f32 %v1294_v6, %v1286_v47  ;;  %v1296_v36 = vpop.eup %1295  ;;  %v1238_v47 = vld [vmem:[%s1555_s9 + $0x8] sm:$0xff] }
 0x1a3   : > { %v895_v37 = vmul.f32 32.0, %v1296_v36  ;;  %vm899_vm7 = vweird.f32 %v1296_v36  ;;  %958 = vmatpush.bf16.msra.mxu1 %v1238_v47 }
 0x1a4   : > { %v746_v8 = vpack.c.bf16 %v742_v7, %v742_v7  ;;  %1021 = vmatpush.bf16.msra.mxu2 %v1240_v3 }
 0x1a5   : > { %v896_v38 = vsub.f32 1.0, %v895_v37 }
 0x1a6   : > { %1197 = vmatmul.msk.bf16.vlgmr.msrb.gmra.mxu3 %vm622_vm0, %v746_v8 }
 0x1a7   : > { %v897_v39 = vmul.f32 %v1296_v36, %v896_v38  ;;  %959 = vmatpush.bf16.msra.mxu1 %v1237_v48 }
 0x1a8   : > { %1022 = vmatpush.bf16.msra.mxu2 %v1239_v4 }
 0x1a9   : > { %v898_v40 = vadd.f32 %v1296_v36, %v897_v39  ;;  %v1277_v39 = vld [vmem:[%s1559_s13] ss:$0 sm:$0xff] }
 0x1ab   : > { %v1486_v41 = vsel %vm899_vm7, %v1296_v36, %v898_v40 }
 0x215   : > { %v782_v9 = vpop.f32.mrf.mxu1 }
 0x216   : > { %v827_v10 = vpack.c.bf16 %v782_v9, %v782_v9 }
 0x218   : > { %829 = vrot.lane.b32.xlu2 %v827_v10, %s1327_s25 }
 0x21d   : > { %v763_v11 = vpop.f32.mrf.mxu0  ;;  %v784_v12 = vpop.f32.mrf.mxu1 }
 0x21e   : > { %v824_v13 = vpack.c.bf16 %v763_v11, %v763_v11 }
 0x220   : > { %826 = vst.msk [vmem:[#allocation2] sm:$0xf] %vm825_vm2, %v824_v13 }
 0x221   : > { %v801_v14 = vpop.f32.mrf.mxu2 }
 0x222   : > { %v834_v15 = vpack.c.bf16 %v801_v14, %v801_v14 }
 0x224   : > { %836 = vrot.lane.b32.xlu0 %v834_v15, %s1328_s26 }
 0x225   : > { %v765_v16 = vpop.f32.mrf.mxu0 }
 0x229   : > { %v803_v17 = vpop.f32.mrf.mxu2  ;;  %v820_v18 = vpop.f32.mrf.mxu3 }
 0x22a   : > { %v841_v19 = vpack.c.bf16 %v820_v18, %v820_v18 }
 0x22c   : > { %843 = vrot.lane.b32.xlu1 %v841_v19, %s1329_s27  ;;  %v1276_v19 = vld [vmem:[%s1558_s12] ss:$0 sm:$0xff] }
 0x231   : > { %v822_v20 = vpop.f32.mrf.mxu3 }
 0x272   : > { %v830_v21 = vpop.permute.xlu2 %829 }
 0x273   : > { %833 = vst.msk [vmem:[#allocation2] sm:$0xf] %vm832_vm3, %v830_v21 }
 0x296   : > { %v837_v24 = vpop.permute.xlu0 %836 }
 0x297   : > { %840 = vst.msk [vmem:[#allocation2] sm:$0xf] %vm839_vm4, %v837_v24 }
 0x29e   : > { %v844_v25 = vpop.permute.xlu1 %843 }
 0x29f   : > { %847 = vst.msk [vmem:[#allocation2] sm:$0xf] %vm846_vm5, %v844_v25 }
 0x2a6   : > { %v850_v26 = vld [vmem:[#allocation2] sm:$0xf] }
 0x2a7   : > { %1206 = vmatmul.msk.bf16.vlgmr.msra.gmra.mxu0 %vm871_vm6, %v850_v26 }
 0x324   : > { %v884_v30 = vpop.f32.mrf.mxu0 }
 0x325   : > { %v885_v31 = vadd.f32 %v1272_v28, %v884_v30 }
 0x327   : > { %v888_v32 = vadd.f32 %v885_v31, %v849_v29 }
 0x329   : > { %v891_v33 = vsel %vm871_vm6, %v888_v32, 0.0 }
 0x32a   : > { %892 = vadd.xlane.f32.xlu2 %v891_v33 }
 0x32c   : > { %v886_v34 = vpop.f32.mrf.mxu0 }
 0x39d   : > { %v893_v42 = vpop.xlane.xlu2 %892 }
 0x39e   : > { %v901_v43 = vmul.f32 %v1486_v41, %v893_v42 }
 0x3a0   : > { %v902_v44 = vsub.f32 %v888_v32, %v901_v43 }
 0x3a2   : > { %v903_v45 = vmul.f32 %v902_v44, %v902_v44 }
 0x3a4   : > { %v904_v46 = vsel %vm871_vm6, %v903_v45, 0.0 }
 0x3a5   : > { %905 = vadd.xlane.f32.xlu0 %v904_v46 }
 0x418   : > { %v906_v49 = vpop.xlane.xlu0 %905 }
 0x419   : > { %v907_v50 = vmul.f32 %v906_v49, %v1486_v41 }
 0x41b   : > { %v908_v51 = vadd.f32 1e-12, %v907_v50 }
 0x41d   : > { %1297 = vrsqrt.f32 %v908_v51  ;;  %vm915_vm9 = vweird.f32 %v908_v51 }
 0x423   : > { %v1298_v52 = vpop.eup %1297 }
 0x424   : > { %v910_v53 = vmul.f32 %v1298_v52, %v908_v51  ;;  %vm916_vm8 = vweird.f32 %v1298_v52 }
 0x425   : > { %vm917_vm10 = vmor %vm915_vm9, %vm916_vm8 }
 0x426   : > { %v911_v54 = vmul.f32 %v1298_v52, %v910_v53 }
 0x428   : > { %v912_v55 = vmul.f32 0.5, %v911_v54 }
 0x42a   : > { %v913_v56 = vsub.f32 1.5, %v912_v55 }
 0x42c   : > { %v914_v57 = vmul.f32 %v1298_v52, %v913_v56 }
 0x42e   : > { %v918_v59 = vsel %vm917_vm10, %v1298_v52, %v914_v57 }
 0x42f   : > { %v919_v61 = vmul.f32 %v918_v59, %v902_v44 }
 0x431   : > { %v923_v62 = vmul.f32 %v1273_v58, %v919_v61 }
 0x433   : > { %v927_v63 = vadd.f32 %v1274_v60, %v923_v62 }
 0x435   : > { %v928_v0 = vpack.c.bf16 %v927_v63, %v927_v63 }
 0x437   : > { %1215 = vmatmul.msk.bf16.vlgmr.msra.gmra.mxu1 %vm871_vm6, %v928_v0 }
 0x4b4   : > { %v961_v6 = vpop.f32.mrf.mxu1 }
 0x4b5   : > { %v962_v7 = vadd.f32 %v1275_v5, %v961_v6 }
 0x4b7   : > { %v966_v8 = vmul.f32 %v962_v7, %v962_v7  ;;  %v965_v15 = vmul.f32 0.5, %v962_v7 }
 0x4b9   : > { %v967_v9 = vmul.f32 %v966_v8, %v962_v7 }
 0x4bb   : > { %v968_v10 = vmul.f32 0.044715, %v967_v9 }
 0x4bc   : > { %v963_v11 = vpop.f32.mrf.mxu1 }
 0x4bd   : > { %v969_v12 = vadd.f32 %v968_v10, %v962_v7 }
 0x4bf   : > { %v970_v13 = vmul.f32 0.7978846, %v969_v12 }
 0x4c1   : > { %1299 = vtanh.f32 %v970_v13 }
 0x4c7   : > { %v1300_v14 = vpop.eup %1299 }
 0x4c8   : > { %v972_v16 = vadd.f32 1.0, %v1300_v14 }
 0x4ca   : > { %v973_v17 = vmul.f32 %v972_v16, %v965_v15 }
 0x4cc   : > { %v974_v18 = vpack.c.bf16 %v973_v17, %v973_v17 }
 0x4ce   : > { %1232 = vmatmul.msk.bf16.vlgmr.msra.gmra.mxu2 %vm1011_vm11, %v974_v18 }
 0x551   : > { %v1024_v20 = vpop.f32.mrf.mxu2 }
 0x552   : > { %v1025_v21 = vadd.f32 %v1276_v19, %v1024_v20 }
 0x554   : > { %v1028_v22 = vadd.f32 %v1025_v21, %v927_v63 }
 0x556   : > { %v1031_v23 = vsel %vm871_vm6, %v1028_v22, 0.0 }
 0x557   : > { %1032 = vadd.xlane.f32.xlu1 %v1031_v23 }
 0x559   : > { %v1026_v24 = vpop.f32.mrf.mxu2 }
 0x5ca   : > { %v1033_v25 = vpop.xlane.xlu1 %1032 }
 0x5cb   : > { %v1034_v26 = vmul.f32 %v1033_v25, %v1486_v41 }
 0x5cd   : > { %v1035_v27 = vsub.f32 %v1028_v22, %v1034_v26 }
 0x5cf   : > { %v1036_v28 = vmul.f32 %v1035_v27, %v1035_v27 }
 0x5d1   : > { %v1037_v29 = vsel %vm871_vm6, %v1036_v28, 0.0 }
 0x5d2   : > { %1038 = vadd.xlane.f32.xlu2 %v1037_v29 }
 0x645   : > { %v1039_v30 = vpop.xlane.xlu2 %1038 }
 0x646   : > { %v1040_v31 = vmul.f32 %v1039_v30, %v1486_v41  ;;  %v1278_v41 = vld [vmem:[%s1560_s14] ss:$0 sm:$0xff] }
 0x648   : > { %v1041_v32 = vadd.f32 1e-12, %v1040_v31 }
 0x64a   : > { %1301 = vrsqrt.f32 %v1041_v32  ;;  %vm1048_vm13 = vweird.f32 %v1041_v32 }
 0x650   : > { %v1302_v33 = vpop.eup %1301 }
 0x651   : > { %v1043_v34 = vmul.f32 %v1302_v33, %v1041_v32  ;;  %vm1049_vm12 = vweird.f32 %v1302_v33 }
 0x652   : > { %vm1050_vm14 = vmor %vm1048_vm13, %vm1049_vm12 }
 0x653   : > { %v1044_v35 = vmul.f32 %v1302_v33, %v1043_v34 }
 0x655   : > { %v1045_v36 = vmul.f32 0.5, %v1044_v35 }
 0x657   : > { %v1046_v37 = vsub.f32 1.5, %v1045_v36 }
 0x659   : > { %v1047_v38 = vmul.f32 %v1302_v33, %v1046_v37 }
 0x65b   : > { %v1051_v40 = vsel %vm1050_vm14, %v1302_v33, %v1047_v38 }
 0x65c   : > { %v1052_v42 = vmul.f32 %v1051_v40, %v1035_v27 }
 0x65e   : > { %v1056_v43 = vmul.f32 %v1277_v39, %v1052_v42 }
 0x660   : > { %v1060_v44 = vadd.f32 %v1278_v41, %v1056_v43 }
 0x662   : > { %v1061_v45 = vpack.c.bf16 %v1060_v44, %v1060_v44 }
 0x664   : > { %1063 = vst.msk [vmem:[%s603_s23] sm:$0xf] %vm1062_vm15, %v1061_v45 }
 0x665 PF: > { %s25_s20 = sadd.s32 1, %s1325_s20   ;;  %s1562_s18 = smov %s1321_s19 }
 0x666   : > { %p22_p6 = scmp.ge.s32.totalorder %s25_s20, 4   ;;  %s1563_s19 = smov %s1565_s21 }
 0x668   :  { %24 = sbr.rel (!%p22_p6) target bundleno = 2 (0x2), region = 122 }

// kernel: _lambda_.29
= control target key start
LH: loop header
LB: loop body
LE: loop exit
PB: predicated region body
PF: predicated region fallthrough
CT: control target
= control target key end

     0   :  { %s165_s0 = inlined_call_operand.vmem [shape: bf16[16,32], index: 0, kind: input, shape index: {}]   ;;  %s166_s1 = inlined_call_operand.vmem [shape: bf16[32,128], index: 1, kind: input, shape index: {}]   ;;  %s167_s2 = inlined_call_operand.vmem [shape: f32[1,128], index: 2, kind: input, shape index: {}]   ;;  %s168_s3 = inlined_call_operand.hbm [shape: f32[16,128], index: 3, kind: output, shape index: {}]  }
   0x1   :  { %v96_v0 = vld [vmem:[%s166_s1 + $0x8] sm:$0xff] }
   0x2   :  { %8 = vsyncpa [#allocation3], 0  ;;  %53 = vmatpush.bf16.msra.mxu0 %v96_v0  ;;  %v95_v1 = vld [vmem:[%s166_s1] sm:$0xff]  ;;  %vm43_vm0 = vcmask 261120   ;;  %s127_s20 = smov [#allocation2]   ;;  %s69_s1 = sshll.u32 %s168_s3, 4  ;;  %s70_s1 = int_to_ptr.hbm [resolvable:$true] %s69_s1 }
   0x3   :  { %v94_v2 = vld [vmem:[%s165_s0] sm:$0xff]  ;;  %s67_s21 = sshll.u32 %s127_s20, 4  ;;  %s128_s0 = smov 128   ;;  %s68_s21 = int_to_ptr.vmem [resolvable:$true] %s67_s21 }
   0x4   :  { %v100_v3 = vld [vmem:[%s167_s2] ss:$0 sm:$0xff]  ;;  %s129_s24 = smov 8  }
   0x6   :  { %54 = vmatpush.bf16.msra.mxu0 %v95_v1 }
   0x9   :  { %93 = vmatmul.msk.bf16.vlgmr.msra.gmra.mxu0 %vm43_vm0, %v94_v2 }
  0x86   :  { %v56_v4 = vpop.f32.mrf.mxu0 }
  0x87   :  { %v57_v5 = vadd.f32 %v100_v3, %v56_v4 }
  0x89   :  { %61 = vst [vmem:[#allocation2] sm:$0xff] %v57_v5 }
  0x8e   :  { %v58_v6 = vpop.f32.mrf.mxu0 }
  0x8f   :  { %v59_v7 = vadd.f32 %v100_v3, %v58_v6 }
  0x91   :  { %62 = vst [vmem:[#allocation2 + $0x8] sm:$0xff] %v59_v7 }
  0x92   :  { %75 = dma.vmem_to_hbm [thread:$0]  %s68_s21, 256, %s70_s1, [#allocation3], %s128_s0, %s128_s0, %s129_s24  }
  0x93   :  { %125 = dma.done.wait [#allocation3], 256  }
  0x94   :  { %126 = vsyncadd [#allocation3], 4294967040 }
  0x95   :  { %80 = vsyncpa [#allocation3], 1 }

</bundles_post_ra>
